<compile_context>
chip_gen: v5e
topology: v5e:2x2
jax: 0.10.0
libtpu: 0.0.40
codegen_flags: <defaults>
</compile_context>

<pallas_src>
import functools

import jax
import jax.numpy as jnp
from jax.experimental import pallas as pl
from jax.experimental.pallas import tpu as pltpu


_LEAKY_SLOPE = 0.01  # torch.nn.LeakyReLU default negative_slope


def _leaky_relu(v):
    return jnp.maximum(v, _LEAKY_SLOPE * v)


def _round_up(v, m):
    return ((v + m - 1) // m) * m


def _v2p_kernel(xfo_ref, w_fused_ref, b_fused_ref,
                w_t1_ref, b_t1_ref,
                w_t2_ref, b_t2_ref,
                w_o1_ref, b_o1_ref,
                w_o2_ref,
                o_ref):
    """One grid step processes a tile of `tb` points with all K neighbors."""
    k_n, tb, fc3 = xfo_ref.shape
    m = w_t2_ref.shape[0]                         # main_channel
    r = k_n * tb
    f32 = jnp.float32
    bf16 = jnp.bfloat16

    # ---- Stage 1: fused mlp_in + mlp_offset, one long MXU stream -------------
    # RHS is block-diagonal: [:F, 0:M]=w_in, [:F, M:2M]=w_in (dup), [F:, 2M:4M]=w_off.
    x2 = xfo_ref[...].reshape(r, fc3)                               # (R, F+3) bf16
    fused = jnp.dot(x2, w_fused_ref[...], preferred_element_type=f32)
    fused = fused + b_fused_ref[...]                                # (R, 4M) f32
    tin2 = _leaky_relu(fused[:, :2 * m])                            # (R, 2M) = [tin | tin]
    ow = jnp.tanh(fused[:, 2 * m:])                                 # (R, 2M)  (EUP)

    # cat(tin, tin - tin0) built WITHOUT a concat:  tin2 - [0 | tin0]
    t3 = tin2.reshape(k_n, tb, 2 * m)
    tin0_2 = t3[0]                                                  # (tb, 2M) = [tin0 | tin0]
    lane = jax.lax.broadcasted_iota(jnp.int32, (tb, 2 * m), 1)
    tin0_masked = jnp.where(lane >= m, tin0_2, 0.0)                 # (tb, 2M) = [0 | tin0]
    cat = (t3 - tin0_masked[None]).reshape(r, 2 * m)                # (R, 2M)
    z = (ow * cat).astype(bf16)                                     # (R, 2M) bf16

    # ---- Stage 2: mlp_tune, still batched over all K neighbors ---------------
    h = _leaky_relu(jnp.dot(z, w_t1_ref[...], preferred_element_type=f32)
                    + b_t1_ref[...])                                # (R, M)
    h = _leaky_relu(jnp.dot(h.astype(bf16), w_t2_ref[...], preferred_element_type=f32)
                    + b_t2_ref[...])                                # (R, M)

    # ---- Stage 3: max over neighbors + anchor residual, then mlp_out ----------
    hmax = jnp.max(h.reshape(k_n, tb, m), axis=0)                   # (tb, M)
    tmp = (hmax + tin0_2[:, :m]).astype(bf16)                       # (tb, M)
    g = _leaky_relu(jnp.dot(tmp, w_o1_ref[...], preferred_element_type=f32)
                    + b_o1_ref[...])                                # (tb, M)
    out = jnp.dot(g.astype(bf16), w_o2_ref[...], preferred_element_type=f32)
    # TODO(synk): for c_out << 128 a lane-dense (C, tb) out layout would avoid
    # masked vst stores; output volume is tiny here so the plain layout is kept.
    o_ref[...] = out.astype(o_ref.dtype)                            # (tb, C)


@functools.partial(jax.jit, static_argnames=("pre_channels", "f_channels", "row_tile"))
def v2p_finetuner_forward(x, d, params, *, pre_channels, f_channels, row_tile=1024):
    """x: (N, K, pre_channels + f_channels + 3) f32.  `d` is unused (as in the torch module)."""
    del d  # the torch forward(x, d) never uses d
    n, k_neighbors, _ = x.shape
    f32, bf16 = jnp.float32, jnp.bfloat16
    m = params["w_t2"].shape[0]
    c_out = params["w_o2"].shape[1]
    f0 = pre_channels
    f1 = pre_channels + f_channels

    # Merge feature+offset into ONE slab, cast to bf16 before the relayout write,
    # then neighbor-major so each grid step reads a contiguous (K, tb, F+3) block.
    xfo = jnp.transpose(x[:, :, f0:f1 + 3].astype(bf16), (1, 0, 2))    # (K, N, F+3)

    # Block-diagonal fused RHS for mlp_in + mlp_offset (tin duplicated so the
    # kernel never needs a 64-lane concat / slice for `cat`).
    w_in, w_off = params["w_in"], params["w_off"]
    w_fused = jnp.zeros((f_channels + 3, 4 * m), f32)
    w_fused = w_fused.at[:f_channels, :m].set(w_in)
    w_fused = w_fused.at[:f_channels, m:2 * m].set(w_in)
    w_fused = w_fused.at[f_channels:, 2 * m:].set(w_off)
    w_fused = w_fused.astype(bf16)
    b_fused = jnp.concatenate(
        [params["b_in"], params["b_in"], params["b_off"]], axis=1)     # (1, 4M) f32

    w_t1 = params["w_t1"].astype(bf16)
    w_t2 = params["w_t2"].astype(bf16)
    w_o1 = params["w_o1"].astype(bf16)
    w_o2 = params["w_o2"].astype(bf16)
    b_t1, b_t2, b_o1 = params["b_t1"], params["b_t2"], params["b_o1"]

    # Point tile.  Ragged edges handled by the cdiv grid (rows are independent,
    # so clipped garbage rows never feed valid rows).  v5e/v6e (128 MiB VMEM)
    # can raise row_tile to 2048; v7x should keep ~1024 (64 MiB VMEM).
    tb = n if n <= row_tile else row_tile
    if n > 512 and tb >= n:
        # Split into >=2 grid steps so v7x's two TensorCores / megacore get work.
        tb = (n + 1) // 2
    tb = _round_up(tb, 16)   # align to the bf16 (16,128) sublane tile for free reshapes
    grid = (pl.cdiv(n, tb),)

    def const_spec(arr):
        nd = arr.ndim
        return pl.BlockSpec(arr.shape, lambda *_: (0,) * nd)

    out = pl.pallas_call(
        _v2p_kernel,
        out_shape=jax.ShapeDtypeStruct((n, c_out), f32),
        grid_spec=pltpu.PrefetchScalarGridSpec(
            num_scalar_prefetch=0,
            grid=grid,
            in_specs=[
                pl.BlockSpec((k_neighbors, tb, f_channels + 3), lambda i: (0, i, 0)),
                const_spec(w_fused), const_spec(b_fused),
                const_spec(w_t1), const_spec(b_t1),
                const_spec(w_t2), const_spec(b_t2),
                const_spec(w_o1), const_spec(b_o1),
                const_spec(w_o2),
            ],
            out_specs=pl.BlockSpec((tb, c_out), lambda i: (i, 0)),
        ),
        compiler_params=pltpu.CompilerParams(
            dimension_semantics=("parallel",),
            vmem_limit_bytes=32 * 1024 * 1024,
        ),
    )(xfo, w_fused, b_fused, w_t1, b_t1, w_t2, b_t2, w_o1, b_o1, w_o2)

    return out


def init_params(key, f_channels, out_channels, main_channel=64):
    """Deterministic init mimicking torch.nn.Linear defaults (U[-1/sqrt(fan_in), +])."""
    m = main_channel
    layers = [
        ("off", 3, 2 * m, True),          # out_finetune_mlp_offset
        ("in", f_channels, m, True),      # out_finetune_mlp_in
        ("t1", 2 * m, m, True),           # out_finetune_mlp_tune[0]
        ("t2", m, m, True),               # out_finetune_mlp_tune[2]
        ("o1", m, m, True),               # out_finetune_mlp_out[0]
        ("o2", m, out_channels, False),   # out_finetune_mlp_out[2] (no bias)
    ]
    params = {}
    for name, fi, fo, has_bias in layers:
        key, kw, kb = jax.random.split(key, 3)
        bound = 1.0 / float(fi) ** 0.5
        # stored as (in_features, out_features): y = x @ W + b
        params[f"w_{name}"] = jax.random.uniform(
            kw, (fi, fo), jnp.float32, minval=-bound, maxval=bound)
        if has_bias:
            params[f"b_{name}"] = jax.random.uniform(
                kb, (1, fo), jnp.float32, minval=-bound, maxval=bound)
    return params


def ref_forward(x, params, pre_channels, f_channels):
    """Pure-JAX reference with the same bf16-operand / f32-accum matmul numerics."""
    bf16 = jnp.bfloat16

    def mm(a, w):
        return jnp.einsum("...i,io->...o", a.astype(bf16), w.astype(bf16),
                          preferred_element_type=jnp.float32)

    f0, f1 = pre_channels, pre_channels + f_channels
    feature = x[:, :, f0:f1]                      # (N, K, F)
    offset = x[:, :, f1:f1 + 3]                   # (N, K, 3)

    tmp_in = _leaky_relu(mm(feature, params["w_in"]) + params["b_in"])      # (N,K,M)
    offset_w = jnp.tanh(mm(offset, params["w_off"]) + params["b_off"])      # (N,K,2M)
    cat = jnp.concatenate([tmp_in, tmp_in - tmp_in[:, :1, :]], axis=2)
    t = offset_w * cat
    t = _leaky_relu(mm(t, params["w_t1"]) + params["b_t1"])
    t = _leaky_relu(mm(t, params["w_t2"]) + params["b_t2"])
    tmp = t.max(axis=1) + tmp_in[:, 0, :]                                   # (N,M)
    g = _leaky_relu(mm(tmp, params["w_o1"]) + params["b_o1"])
    return mm(g, params["w_o2"])                                            # (N,C)


if __name__ == "__main__":
    pre_channels, f_channels, out_channels = 4, 32, 4
    k_neighbors, main_channel = 6, 64
    n_points = 200  # deliberately not a multiple of the point tile

    key = jax.random.PRNGKey(0)
    key, kx = jax.random.split(key)
    x = jax.random.normal(
        kx, (n_points, k_neighbors, pre_channels + f_channels + 3), jnp.float32)
    d = None  # forward(x, d): d is unused by the torch module itself

    params = init_params(key, f_channels, out_channels, main_channel)

    # Small row_tile so the tiny demo exercises a multi-step, ragged grid;
    # production default is row_tile=1024 (2048 on v5e/v6e).
    y = v2p_finetuner_forward(x, d, params, pre_channels=pre_channels,
                              f_channels=f_channels, row_tile=64)
    y = jax.block_until_ready(y)

    y_ref = ref_forward(x, params, pre_channels, f_channels)
    assert y.shape == (n_points, out_channels)
    assert jnp.allclose(y, y_ref, atol=2e-2, rtol=2e-2), "mismatch vs reference"

    print("KERNEL_OK")
</pallas_src>

<mosaic_0001>
module attributes {stable_mosaic.version = 11 : i64} {
  func.func @_v2p_kernel(%arg0: i32, %arg1: memref<6x64x35xbf16, #tpu.memory_space<vmem>>, %arg2: memref<35x256xbf16, #tpu.memory_space<vmem>>, %arg3: memref<1x256xf32, #tpu.memory_space<vmem>>, %arg4: memref<128x64xbf16, #tpu.memory_space<vmem>>, %arg5: memref<1x64xf32, #tpu.memory_space<vmem>>, %arg6: memref<64x64xbf16, #tpu.memory_space<vmem>>, %arg7: memref<1x64xf32, #tpu.memory_space<vmem>>, %arg8: memref<64x64xbf16, #tpu.memory_space<vmem>>, %arg9: memref<1x64xf32, #tpu.memory_space<vmem>>, %arg10: memref<64x4xbf16, #tpu.memory_space<vmem>>, %arg11: memref<64x4xf32, #tpu.memory_space<vmem>>) attributes {dimension_semantics = [#tpu.dimension_semantics<parallel>], iteration_bounds = array<i64: 4>, scalar_prefetch = 0 : i64, scratch_operands = 0 : i64, tpu.core_type = #tpu.core_type<tc>, window_params = [{transform_indices = @transform_0, window_bounds = array<i64: 6, 64, 35>}, {pipeline_mode = #tpu.pipeline_mode<synchronous>, transform_indices = @transform_1, window_bounds = array<i64: 35, 256>}, {pipeline_mode = #tpu.pipeline_mode<synchronous>, transform_indices = @transform_2, window_bounds = array<i64: 1, 256>}, {pipeline_mode = #tpu.pipeline_mode<synchronous>, transform_indices = @transform_3, window_bounds = array<i64: 128, 64>}, {pipeline_mode = #tpu.pipeline_mode<synchronous>, transform_indices = @transform_4, window_bounds = array<i64: 1, 64>}, {pipeline_mode = #tpu.pipeline_mode<synchronous>, transform_indices = @transform_5, window_bounds = array<i64: 64, 64>}, {pipeline_mode = #tpu.pipeline_mode<synchronous>, transform_indices = @transform_6, window_bounds = array<i64: 1, 64>}, {pipeline_mode = #tpu.pipeline_mode<synchronous>, transform_indices = @transform_7, window_bounds = array<i64: 64, 64>}, {pipeline_mode = #tpu.pipeline_mode<synchronous>, transform_indices = @transform_8, window_bounds = array<i64: 1, 64>}, {pipeline_mode = #tpu.pipeline_mode<synchronous>, transform_indices = @transform_9, window_bounds = array<i64: 64, 4>}, {transform_indices = @transform_10, window_bounds = array<i64: 64, 4>}]} {
    %c0 = arith.constant 0 : index
    %c0_0 = arith.constant 0 : index
    %c0_1 = arith.constant 0 : index
    %0 = vector.load %arg1[%c0, %c0_0, %c0_1] : memref<6x64x35xbf16, #tpu.memory_space<vmem>>, vector<6x64x35xbf16>
    %1 = vector.shape_cast %0 : vector<6x64x35xbf16> to vector<384x35xbf16>
    %c0_2 = arith.constant 0 : index
    %c0_3 = arith.constant 0 : index
    %2 = vector.load %arg2[%c0_2, %c0_3] : memref<35x256xbf16, #tpu.memory_space<vmem>>, vector<35x256xbf16>
    %cst = arith.constant dense<0.000000e+00> : vector<384x256xf32>
    %3 = tpu.matmul %1, %2, %cst {dimension_numbers = #tpu.dot_dimension_numbers<[1], [0], [0], [1], [0, 0, 1, 1], [], []>} : vector<384x35xbf16>, vector<35x256xbf16>, vector<384x256xf32> -> vector<384x256xf32>
    %c0_4 = arith.constant 0 : index
    %c0_5 = arith.constant 0 : index
    %4 = vector.load %arg3[%c0_4, %c0_5] : memref<1x256xf32, #tpu.memory_space<vmem>>, vector<1x256xf32>
    %5 = vector.broadcast %4 : vector<1x256xf32> to vector<384x256xf32>
    %6 = arith.addf %3, %5 : vector<384x256xf32>
    %7 = vector.extract_strided_slice %6 {offsets = [0, 0], sizes = [384, 128], strides = [1, 1]} : vector<384x256xf32> to vector<384x128xf32>
    %cst_6 = arith.constant 0.00999999977 : f32
    %8 = vector.broadcast %cst_6 : f32 to vector<384x128xf32>
    %9 = arith.mulf %8, %7 : vector<384x128xf32>
    %10 = arith.maximumf %7, %9 : vector<384x128xf32>
    %11 = vector.extract_strided_slice %6 {offsets = [0, 128], sizes = [384, 128], strides = [1, 1]} : vector<384x256xf32> to vector<384x128xf32>
    %12 = math.tanh %11 : vector<384x128xf32>
    %13 = vector.shape_cast %10 : vector<384x128xf32> to vector<6x64x128xf32>
    %14 = vector.extract_strided_slice %13 {offsets = [0, 0, 0], sizes = [1, 64, 128], strides = [1, 1, 1]} : vector<6x64x128xf32> to vector<1x64x128xf32>
    %15 = vector.shape_cast %14 : vector<1x64x128xf32> to vector<64x128xf32>
    %16 = tpu.iota {dimensions = array<i32: 1>} : vector<64x128xi32>
    %c64_i32 = arith.constant 64 : i32
    %17 = vector.broadcast %c64_i32 : i32 to vector<64x128xi32>
    %18 = arith.cmpi sge, %16, %17 : vector<64x128xi32>
    %cst_7 = arith.constant 0.000000e+00 : f32
    %19 = vector.broadcast %cst_7 : f32 to vector<64x128xf32>
    %20 = arith.select %18, %15, %19 : vector<64x128xi1>, vector<64x128xf32>
    %21 = vector.shape_cast %20 : vector<64x128xf32> to vector<1x64x128xf32>
    %22 = vector.broadcast %21 : vector<1x64x128xf32> to vector<6x64x128xf32>
    %23 = arith.subf %13, %22 : vector<6x64x128xf32>
    %24 = vector.shape_cast %23 : vector<6x64x128xf32> to vector<384x128xf32>
    %25 = arith.mulf %12, %24 : vector<384x128xf32>
    %26 = arith.truncf %25 : vector<384x128xf32> to vector<384x128xbf16>
    %c0_8 = arith.constant 0 : index
    %c0_9 = arith.constant 0 : index
    %27 = vector.load %arg4[%c0_8, %c0_9] : memref<128x64xbf16, #tpu.memory_space<vmem>>, vector<128x64xbf16>
    %cst_10 = arith.constant dense<0.000000e+00> : vector<384x64xf32>
    %28 = tpu.matmul %26, %27, %cst_10 {dimension_numbers = #tpu.dot_dimension_numbers<[1], [0], [0], [1], [0, 0, 1, 1], [], []>} : vector<384x128xbf16>, vector<128x64xbf16>, vector<384x64xf32> -> vector<384x64xf32>
    %c0_11 = arith.constant 0 : index
    %c0_12 = arith.constant 0 : index
    %29 = vector.load %arg5[%c0_11, %c0_12] : memref<1x64xf32, #tpu.memory_space<vmem>>, vector<1x64xf32>
    %30 = vector.broadcast %29 : vector<1x64xf32> to vector<384x64xf32>
    %31 = arith.addf %28, %30 : vector<384x64xf32>
    %cst_13 = arith.constant 0.00999999977 : f32
    %32 = vector.broadcast %cst_13 : f32 to vector<384x64xf32>
    %33 = arith.mulf %32, %31 : vector<384x64xf32>
    %34 = arith.maximumf %31, %33 : vector<384x64xf32>
    %35 = arith.truncf %34 : vector<384x64xf32> to vector<384x64xbf16>
    %c0_14 = arith.constant 0 : index
    %c0_15 = arith.constant 0 : index
    %36 = vector.load %arg6[%c0_14, %c0_15] : memref<64x64xbf16, #tpu.memory_space<vmem>>, vector<64x64xbf16>
    %cst_16 = arith.constant dense<0.000000e+00> : vector<384x64xf32>
    %37 = tpu.matmul %35, %36, %cst_16 {dimension_numbers = #tpu.dot_dimension_numbers<[1], [0], [0], [1], [0, 0, 1, 1], [], []>} : vector<384x64xbf16>, vector<64x64xbf16>, vector<384x64xf32> -> vector<384x64xf32>
    %c0_17 = arith.constant 0 : index
    %c0_18 = arith.constant 0 : index
    %38 = vector.load %arg7[%c0_17, %c0_18] : memref<1x64xf32, #tpu.memory_space<vmem>>, vector<1x64xf32>
    %39 = vector.broadcast %38 : vector<1x64xf32> to vector<384x64xf32>
    %40 = arith.addf %37, %39 : vector<384x64xf32>
    %cst_19 = arith.constant 0.00999999977 : f32
    %41 = vector.broadcast %cst_19 : f32 to vector<384x64xf32>
    %42 = arith.mulf %41, %40 : vector<384x64xf32>
    %43 = arith.maximumf %40, %42 : vector<384x64xf32>
    %44 = vector.shape_cast %43 : vector<384x64xf32> to vector<6x64x64xf32>
    %cst_20 = arith.constant dense<0xFF800000> : vector<64x64xf32>
    %45 = vector.multi_reduction <maximumf>, %44, %cst_20 [0] : vector<6x64x64xf32> to vector<64x64xf32>
    %46 = vector.extract_strided_slice %15 {offsets = [0, 0], sizes = [64, 64], strides = [1, 1]} : vector<64x128xf32> to vector<64x64xf32>
    %47 = arith.addf %45, %46 : vector<64x64xf32>
    %48 = arith.truncf %47 : vector<64x64xf32> to vector<64x64xbf16>
    %c0_21 = arith.constant 0 : index
    %c0_22 = arith.constant 0 : index
    %49 = vector.load %arg8[%c0_21, %c0_22] : memref<64x64xbf16, #tpu.memory_space<vmem>>, vector<64x64xbf16>
    %cst_23 = arith.constant dense<0.000000e+00> : vector<64x64xf32>
    %50 = tpu.matmul %48, %49, %cst_23 {dimension_numbers = #tpu.dot_dimension_numbers<[1], [0], [0], [1], [0, 0, 1, 1], [], []>} : vector<64x64xbf16>, vector<64x64xbf16>, vector<64x64xf32> -> vector<64x64xf32>
    %c0_24 = arith.constant 0 : index
    %c0_25 = arith.constant 0 : index
    %51 = vector.load %arg9[%c0_24, %c0_25] : memref<1x64xf32, #tpu.memory_space<vmem>>, vector<1x64xf32>
    %52 = vector.broadcast %51 : vector<1x64xf32> to vector<64x64xf32>
    %53 = arith.addf %50, %52 : vector<64x64xf32>
    %cst_26 = arith.constant 0.00999999977 : f32
    %54 = vector.broadcast %cst_26 : f32 to vector<64x64xf32>
    %55 = arith.mulf %54, %53 : vector<64x64xf32>
    %56 = arith.maximumf %53, %55 : vector<64x64xf32>
    %57 = arith.truncf %56 : vector<64x64xf32> to vector<64x64xbf16>
    %c0_27 = arith.constant 0 : index
    %c0_28 = arith.constant 0 : index
    %58 = vector.load %arg10[%c0_27, %c0_28] : memref<64x4xbf16, #tpu.memory_space<vmem>>, vector<64x4xbf16>
    %cst_29 = arith.constant dense<0.000000e+00> : vector<64x4xf32>
    %59 = tpu.matmul %57, %58, %cst_29 {dimension_numbers = #tpu.dot_dimension_numbers<[1], [0], [0], [1], [0, 0, 1, 1], [], []>} : vector<64x64xbf16>, vector<64x4xbf16>, vector<64x4xf32> -> vector<64x4xf32>
    %c0_30 = arith.constant 0 : index
    %c0_31 = arith.constant 0 : index
    %60 = vector.load %arg11[%c0_30, %c0_31] : memref<64x4xf32, #tpu.memory_space<vmem>>, vector<64x4xf32>
    tpu.vector_store %arg11[%c0_30, %c0_31], %59 {strides = array<i32>} : memref<64x4xf32, #tpu.memory_space<vmem>>, vector<64x4xf32>,
    return
  }
  func.func @transform_0(%arg0: i32) -> (i32, i32, i32) {
    %c0_i32 = arith.constant 0 : i32
    %c0_i32_0 = arith.constant 0 : i32
    %c0_i32_1 = arith.constant 0 : i32
    return %c0_i32, %arg0, %c0_i32_0 : i32, i32, i32
  }
  func.func @transform_1(%arg0: i32) -> (i32, i32) {
    %c0_i32 = arith.constant 0 : i32
    %c0_i32_0 = arith.constant 0 : i32
    %c0_i32_1 = arith.constant 0 : i32
    return %c0_i32, %c0_i32_0 : i32, i32
  }
  func.func @transform_2(%arg0: i32) -> (i32, i32) {
    %c0_i32 = arith.constant 0 : i32
    %c0_i32_0 = arith.constant 0 : i32
    %c0_i32_1 = arith.constant 0 : i32
    return %c0_i32, %c0_i32_0 : i32, i32
  }
  func.func @transform_3(%arg0: i32) -> (i32, i32) {
    %c0_i32 = arith.constant 0 : i32
    %c0_i32_0 = arith.constant 0 : i32
    %c0_i32_1 = arith.constant 0 : i32
    return %c0_i32, %c0_i32_0 : i32, i32
  }
  func.func @transform_4(%arg0: i32) -> (i32, i32) {
    %c0_i32 = arith.constant 0 : i32
    %c0_i32_0 = arith.constant 0 : i32
    %c0_i32_1 = arith.constant 0 : i32
    return %c0_i32, %c0_i32_0 : i32, i32
  }
  func.func @transform_5(%arg0: i32) -> (i32, i32) {
    %c0_i32 = arith.constant 0 : i32
    %c0_i32_0 = arith.constant 0 : i32
    %c0_i32_1 = arith.constant 0 : i32
    return %c0_i32, %c0_i32_0 : i32, i32
  }
  func.func @transform_6(%arg0: i32) -> (i32, i32) {
    %c0_i32 = arith.constant 0 : i32
    %c0_i32_0 = arith.constant 0 : i32
    %c0_i32_1 = arith.constant 0 : i32
    return %c0_i32, %c0_i32_0 : i32, i32
  }
  func.func @transform_7(%arg0: i32) -> (i32, i32) {
    %c0_i32 = arith.constant 0 : i32
    %c0_i32_0 = arith.constant 0 : i32
    %c0_i32_1 = arith.constant 0 : i32
    return %c0_i32, %c0_i32_0 : i32, i32
  }
  func.func @transform_8(%arg0: i32) -> (i32, i32) {
    %c0_i32 = arith.constant 0 : i32
    %c0_i32_0 = arith.constant 0 : i32
    %c0_i32_1 = arith.constant 0 : i32
    return %c0_i32, %c0_i32_0 : i32, i32
  }
  func.func @transform_9(%arg0: i32) -> (i32, i32) {
    %c0_i32 = arith.constant 0 : i32
    %c0_i32_0 = arith.constant 0 : i32
    %c0_i32_1 = arith.constant 0 : i32
    return %c0_i32, %c0_i32_0 : i32, i32
  }
  func.func @transform_10(%arg0: i32) -> (i32, i32) {
    %c0_i32 = arith.constant 0 : i32
    %c0_i32_0 = arith.constant 0 : i32
    return %arg0, %c0_i32 : i32, i32
  }
}

</mosaic_0001>

<bundles_post_ra>
// kernel: v2p_finetuner_forward.1
= control target key start
LH: loop header
LB: loop body
LE: loop exit
PB: predicated region body
PF: predicated region fallthrough
CT: control target
= control target key end

     0   :  { %s4612_s0 = inlined_call_operand.vmem [shape: bf16[6,200,35], index: 0, kind: input, shape index: {}]   ;;  %s4613_s1 = inlined_call_operand.vmem [shape: bf16[35,256], index: 1, kind: input, shape index: {}]   ;;  %s4614_s2 = inlined_call_operand.vmem [shape: f32[1,256], index: 2, kind: input, shape index: {}]   ;;  %s4615_s3 = inlined_call_operand.vmem [shape: bf16[128,64], index: 3, kind: input, shape index: {}]   ;;  %s4616_s4 = inlined_call_operand.vmem [shape: f32[1,64], index: 4, kind: input, shape index: {}]   ;;  %s4617_s5 = inlined_call_operand.vmem [shape: bf16[64,64], index: 5, kind: input, shape index: {}]   ;;  %s4618_s6 = inlined_call_operand.vmem [shape: f32[1,64], index: 6, kind: input, shape index: {}]   ;;  %s4619_s7 = inlined_call_operand.vmem [shape: bf16[64,64], index: 7, kind: input, shape index: {}]   ;;  %s4620_s8 = inlined_call_operand.vmem [shape: f32[1,64], index: 8, kind: input, shape index: {}]   ;;  %s4621_s9 = inlined_call_operand.vmem [shape: bf16[64,4], index: 9, kind: input, shape index: {}]   ;;  %s4622_s10 = inlined_call_operand.vmem [shape: f32[200,4], index: 10, kind: output, shape index: {}]  }
   0x1   :  { %4623 = sst [smem:[#allocation5_spill]] %s4612_s0 }
   0x2   :  { %s3569_s13 = smov 0   ;;  %s3571_s14 = smov 0  }
   0x3   :  { %s3573_s15 = smov 0  }
   0x4 LB: > { %s3585_s16 = sadd.s32 4294967295, %s3447_s15   ;;  %s3588_s17 = sadd.s32 1, %s3447_s15   ;;  %s3447_s15 = sphi %s3573_s15, %s4642_s15   ;;  %s3443_s14 = sphi %s3571_s14, %s4641_s14   ;;  %s3439_s13 = sphi %s3569_s13, %s4640_s13  }
   0x5   : > { %s24_s18 = ssub.s32 %s3447_s15, %s3588_s17  ;;  %s27_s19 = sadd.s32 1, %s3443_s14 }
   0x6   : > { %p25_p0 = scmp.eq.s32.totalorder %s24_s18, 0  ;;  %p34_p1 = scmp.ne.s32.totalorder %s3443_s14, %s3439_s13 }
   0x7   : > { %p35_p2 = scmp.eq.s32.totalorder %s3447_s15, 0  ;;  %p253_p3 = scmp.eq.s32.totalorder %s3585_s16, 3 }
   0x8   : > { %s3598_s20 = scalar_select %p25_p0, %s3443_s14, %s27_s19  }
   0x9   : > { %p36_p4 = por %p35_p2, %p34_p1  ;;  %p3600_p5 = por %p253_p3, %p34_p1 }
   0xa   : > { %4624 = sst [smem:[#allocation4_spill]] %s3598_s20  ;;  %p2739_p6 = scmp.ge.s32.totalorder %s3447_s15, 4 }
   0xc   : > { %302 = sbr.rel (%p2739_p6) target bundleno = 110 (0x6e), region = 52 }
  0x11   : > { %305 = sbr.rel (!%p36_p4) target bundleno = 110 (0x6e), region = 56  ;;  %s307_s22 = sand.u32 (%p36_p4), 1, %s3443_s14  }
  0x12   : > { %s2740_s23 = sshll.u32 (%p36_p4), %s3447_s15, 3  ;;  %s3099_s24 = smul.u32 (%p36_p4), 192, %s307_s22 }
  0x13   : > { %s311_s25 = ssub.s32 (%p36_p4), 25, %s2740_s23  ;;  %s3041_s26 = sshll.u32 (%p36_p4), %s3447_s15, 5 }
  0x14   : > { %p312_p7 = scmp.lt.s32.totalorder (%p36_p4), %s311_s25, 8  ;;  %s4626_s0 = sld [smem:[#allocation5_spill]] (%p36_p4) }
  0x15   : > { %s3616_s11 = scalar_lea.vmem (%p36_p4), [#allocation2], %s3099_s24  }
  0x16   : > { %s4644_s25 = smov (!%p312_p7, %s311_s25), 8 }
  0x17   : > { %s314_s30 = smul.u32 24, %s4644_s25 }
  0x19   : > { %p2743_p8 = scmp.eq.s32.totalorder %s314_s30, 0 }
  0x1a   : > { %s3611_s29 = scalar_lea.vmem %s4626_s0, %s3041_s26   ;;  %3255 = sdivrem.u32 (!%p2743_p8), %s4644_s25, 6 }
  0x1b   : > { %320 = sbr.rel (%p2743_p8) target bundleno = 110 (0x6e), region = 60 }
  0x23   : > { %s3619_s12 = spop.drf %3255 }
  0x24   : > { %s3257_s18 = spop.drf %3255  ;;  %p2744_p9 = scmp.le.s32.totalorder %s3619_s12, 0 }
  0x25   : > { %s4627_s19 = smov (!%p2744_p9), %s3616_s11  ;;  %s4628_s22 = smov (!%p2744_p9), %s3611_s29 }
  0x26   : > { %2665 = sbr.rel (%p2744_p9) target bundleno = 80 (0x50), region = 225  ;;  %s3628_s23 = smov (!%p2744_p9), 0  }
  0x27   : > { %s3630_s24 = smov (!%p2744_p9), 0  }
  0x2b LB: >> { %v338_v0 = vld [vmem:[%s3455_s22] sm:$0xf]  ;;  %v340_v1 = vld [vmem:[%s3455_s22 + $0x4] sm:$0xf]  ;;  %v342_v2 = vld [vmem:[%s3455_s22 + $0x8] sm:$0xf]  ;;  %s3463_s24 = sphi %s3630_s24, %s332_s24   ;;  %s3459_s23 = sphi %s3628_s23, %s4631_s23   ;;  %s3455_s22 = sphi %s4628_s22, %s4630_s22   ;;  %s3451_s19 = sphi %s4627_s19, %s4629_s19  }
  0x2c   : >> { %339 = vst [vmem:[%s3451_s19] sm:$0xf] %v338_v0  ;;  %v344_v3 = vld [vmem:[%s3455_s22 + $0xc] sm:$0xf]  ;;  %v346_v4 = vld [vmem:[%s3455_s22 + $0x10] sm:$0xf]  ;;  %s410_s26 = sadd.s32 1, %s3459_s23 }
  0x2d   : >> { %341 = vst [vmem:[%s3451_s19 + $0x4] sm:$0xf] %v340_v1  ;;  %v348_v5 = vld [vmem:[%s3455_s22 + $0x14] sm:$0xf]  ;;  %v350_v6 = vld [vmem:[%s3455_s22 + $0x64] sm:$0xf]  ;;  %p411_p10 = scmp.ge.s32.totalorder %s410_s26, %s3619_s12 }
  0x2e   : >> { %343 = vst [vmem:[%s3451_s19 + $0x8] sm:$0xf] %v342_v2  ;;  %v352_v7 = vld [vmem:[%s3455_s22 + $0x68] sm:$0xf]  ;;  %v354_v8 = vld [vmem:[%s3455_s22 + $0x6c] sm:$0xf] }
  0x2f   : >> { %345 = vst [vmem:[%s3451_s19 + $0xc] sm:$0xf] %v344_v3  ;;  %v356_v9 = vld [vmem:[%s3455_s22 + $0x70] sm:$0xf]  ;;  %v358_v10 = vld [vmem:[%s3455_s22 + $0x74] sm:$0xf] }
  0x30   : >> { %347 = vst [vmem:[%s3451_s19 + $0x10] sm:$0xf] %v346_v4  ;;  %v360_v11 = vld [vmem:[%s3455_s22 + $0x78] sm:$0xf]  ;;  %v362_v12 = vld [vmem:[%s3455_s22 + $0xc8] sm:$0xf] }
  0x31   : >> { %349 = vst [vmem:[%s3451_s19 + $0x14] sm:$0xf] %v348_v5  ;;  %v364_v13 = vld [vmem:[%s3455_s22 + $0xcc] sm:$0xf]  ;;  %v366_v14 = vld [vmem:[%s3455_s22 + $0xd0] sm:$0xf] }
  0x32   : >> { %351 = vst [vmem:[%s3451_s19 + $0x20] sm:$0xf] %v350_v6  ;;  %v368_v15 = vld [vmem:[%s3455_s22 + $0xd4] sm:$0xf]  ;;  %v370_v16 = vld [vmem:[%s3455_s22 + $0xd8] sm:$0xf] }
  0x33   : >> { %353 = vst [vmem:[%s3451_s19 + $0x24] sm:$0xf] %v352_v7  ;;  %v372_v17 = vld [vmem:[%s3455_s22 + $0xdc] sm:$0xf]  ;;  %v374_v18 = vld [vmem:[%s3455_s22 + $0x12c] sm:$0xf] }
  0x34   : >> { %355 = vst [vmem:[%s3451_s19 + $0x28] sm:$0xf] %v354_v8  ;;  %v376_v19 = vld [vmem:[%s3455_s22 + $0x130] sm:$0xf]  ;;  %s4646_s26 = smov (%p411_p10, %s410_s26), 0  ;;  %s332_s24 = sadd.s32 1, %s3463_s24  }
  0x35   : >> { %357 = vst [vmem:[%s3451_s19 + $0x2c] sm:$0xf] %v356_v9  ;;  %v378_v20 = vld [vmem:[%s3455_s22 + $0x134] sm:$0xf]  ;;  %v380_v21 = vld [vmem:[%s3455_s22 + $0x138] sm:$0xf]  ;;  %p331_p11 = scmp.ge.s32.totalorder %s332_s24, %s3619_s12  ;;  %s4631_s23 = smov %s4646_s26 }
  0x36   : >> { %359 = vst [vmem:[%s3451_s19 + $0x30] sm:$0xf] %v358_v10  ;;  %s413_s27 = smul.u32 24, %s4646_s26  ;;  %v382_v22 = vld [vmem:[%s3455_s22 + $0x13c] sm:$0xf] }
  0x37   : >> { %361 = vst [vmem:[%s3451_s19 + $0x34] sm:$0xf] %v360_v11  ;;  %v384_v23 = vld [vmem:[%s3455_s22 + $0x140] sm:$0xf]  ;;  %v386_v24 = vld [vmem:[%s3455_s22 + $0x190] sm:$0xf] }
  0x38   : >> { %363 = vst [vmem:[%s3451_s19 + $0x40] sm:$0xf] %v362_v12  ;;  %s3695_s28 = scalar_lea.vmem %s3611_s29, %s413_s27   ;;  %s3698_s30 = scalar_lea.vmem %s3616_s11, %s413_s27 [#allocation2]   ;;  %v388_v25 = vld [vmem:[%s3455_s22 + $0x194] sm:$0xf]  ;;  %v390_v26 = vld [vmem:[%s3455_s22 + $0x198] sm:$0xf] }
  0x39   : >> { %365 = vst [vmem:[%s3451_s19 + $0x44] sm:$0xf] %v364_v13  ;;  %v392_v27 = vld [vmem:[%s3455_s22 + $0x19c] sm:$0xf]  ;;  %v394_v28 = vld [vmem:[%s3455_s22 + $0x1a0] sm:$0xf] }
  0x3a   : >> { %367 = vst [vmem:[%s3451_s19 + $0x48] sm:$0xf] %v366_v14  ;;  %v396_v29 = vld [vmem:[%s3455_s22 + $0x1a4] sm:$0xf]  ;;  %v398_v30 = vld [vmem:[%s3455_s22 + $0x1f4] sm:$0xf] }
  0x3b   : >> { %369 = vst [vmem:[%s3451_s19 + $0x4c] sm:$0xf] %v368_v15  ;;  %v400_v31 = vld [vmem:[%s3455_s22 + $0x1f8] sm:$0xf]  ;;  %v402_v32 = vld [vmem:[%s3455_s22 + $0x1fc] sm:$0xf] }
  0x3c   : >> { %371 = vst [vmem:[%s3451_s19 + $0x50] sm:$0xf] %v370_v16  ;;  %v404_v33 = vld [vmem:[%s3455_s22 + $0x200] sm:$0xf]  ;;  %v406_v34 = vld [vmem:[%s3455_s22 + $0x204] sm:$0xf] }
  0x3d   : >> { %373 = vst [vmem:[%s3451_s19 + $0x54] sm:$0xf] %v372_v17  ;;  %v408_v35 = vld [vmem:[%s3455_s22 + $0x208] sm:$0xf]  ;;  %s4630_s22 = smov %s3695_s28 }
  0x3e   : >> { %375 = vst [vmem:[%s3451_s19 + $0x60] sm:$0xf] %v374_v18 }
  0x3f   : >> { %377 = vst [vmem:[%s3451_s19 + $0x64] sm:$0xf] %v376_v19 }
  0x40   : >> { %379 = vst [vmem:[%s3451_s19 + $0x68] sm:$0xf] %v378_v20 }
  0x41   : >> { %381 = vst [vmem:[%s3451_s19 + $0x6c] sm:$0xf] %v380_v21 }
  0x42   : >> { %383 = vst [vmem:[%s3451_s19 + $0x70] sm:$0xf] %v382_v22 }
  0x43   : >> { %385 = vst [vmem:[%s3451_s19 + $0x74] sm:$0xf] %v384_v23 }
  0x44   : >> { %387 = vst [vmem:[%s3451_s19 + $0x80] sm:$0xf] %v386_v24 }
  0x45   : >> { %389 = vst [vmem:[%s3451_s19 + $0x84] sm:$0xf] %v388_v25 }
  0x46   : >> { %391 = vst [vmem:[%s3451_s19 + $0x88] sm:$0xf] %v390_v26 }
  0x47   : >> { %393 = vst [vmem:[%s3451_s19 + $0x8c] sm:$0xf] %v392_v27 }
  0x48   : >> { %395 = vst [vmem:[%s3451_s19 + $0x90] sm:$0xf] %v394_v28 }
  0x49   : >> { %397 = vst [vmem:[%s3451_s19 + $0x94] sm:$0xf] %v396_v29 }
  0x4a   : >> { %399 = vst [vmem:[%s3451_s19 + $0xa0] sm:$0xf] %v398_v30 }
  0x4b   : >> { %401 = vst [vmem:[%s3451_s19 + $0xa4] sm:$0xf] %v400_v31  ;;  %334 = sbr.rel (!%p331_p11) target bundleno = 43 (0x2b), region = 231 }
  0x4c   : >> { %403 = vst [vmem:[%s3451_s19 + $0xa8] sm:$0xf] %v402_v32 }
  0x4d   : >> { %405 = vst [vmem:[%s3451_s19 + $0xac] sm:$0xf] %v404_v33 }
  0x4e   : >> { %407 = vst [vmem:[%s3451_s19 + $0xb0] sm:$0xf] %v406_v34 }
  0x4f   : >> { %409 = vst [vmem:[%s3451_s19 + $0xb4] sm:$0xf] %v408_v35  ;;  %s4629_s19 = smov %s3698_s30 }
  0x50 PF: > { %3258 = sdivrem.u32 %s4644_s25, 6 }
  0x51   : > { %s2745_s18 = smul.u32 24, %s3619_s12 }
  0x53   : > { %s3743_s27 = scalar_lea.vmem %s3611_s29, %s2745_s18   ;;  %s3746_s0 = scalar_lea.vmem %s3616_s11, %s2745_s18 [#allocation2]  }
  0x59   : > { %s3259_s20 = spop.drf %3258 }
  0x5a   : > { %s3748_s30 = spop.drf %3258 }
  0x5b   : > { %p2747_p12 = scmp.le.s32.totalorder %s3748_s30, 0 }
  0x5c   : > { %s4632_s19 = smov (!%p2747_p12), %s3746_s0  ;;  %s4633_s22 = smov (!%p2747_p12), %s3743_s27 }
  0x5d   : > { %2679 = sbr.rel (%p2747_p12) target bundleno = 110 (0x6e), region = 236  ;;  %s3757_s23 = smov (!%p2747_p12), 0  }
  0x5e   : > { %s3759_s25 = smov (!%p2747_p12), 0  }
  0x62 LB: >> { %v433_v36 = vld [vmem:[%s3471_s22] sm:$0xf]  ;;  %v435_v37 = vld [vmem:[%s3471_s22 + $0x64] sm:$0xf]  ;;  %v437_v38 = vld [vmem:[%s3471_s22 + $0xc8] sm:$0xf]  ;;  %s3479_s25 = sphi %s3759_s25, %s427_s25   ;;  %s3475_s23 = sphi %s3757_s23, %s4634_s23   ;;  %s3471_s22 = sphi %s4633_s22, %s450_s22   ;;  %s3467_s19 = sphi %s4632_s19, %s451_s19  }
  0x63   : >> { %434 = vst [vmem:[%s3467_s19] sm:$0xf] %v433_v36  ;;  %v439_v39 = vld [vmem:[%s3471_s22 + $0x12c] sm:$0xf]  ;;  %s445_s20 = sadd.s32 1, %s3475_s23  ;;  %v441_v40 = vld [vmem:[%s3471_s22 + $0x190] sm:$0xf] }
  0x64   : >> { %436 = vst [vmem:[%s3467_s19 + $0x20] sm:$0xf] %v435_v37  ;;  %p446_p13 = scmp.ge.s32.totalorder %s445_s20, %s3748_s30  ;;  %v443_v41 = vld [vmem:[%s3471_s22 + $0x1f4] sm:$0xf]  ;;  %s427_s25 = sadd.s32 1, %s3479_s25  }
  0x65   : >> { %438 = vst [vmem:[%s3467_s19 + $0x40] sm:$0xf] %v437_v38  ;;  %p426_p0 = scmp.ge.s32.totalorder %s427_s25, %s3748_s30 }
  0x66   : >> { %440 = vst [vmem:[%s3467_s19 + $0x60] sm:$0xf] %v439_v39  ;;  %s4648_s20 = smov (%p446_p13, %s445_s20), 0 }
  0x67   : >> { %442 = vst [vmem:[%s3467_s19 + $0x80] sm:$0xf] %v441_v40  ;;  %s2748_s29 = sshll.u32 %s4648_s20, 2  ;;  %s4634_s23 = smov %s4648_s20 }
  0x68   : >> { %444 = vst [vmem:[%s3467_s19 + $0xa0] sm:$0xf] %v443_v41  ;;  %s450_s22 = scalar_lea.vmem %s3743_s27, %s2748_s29   ;;  %s451_s19 = scalar_lea.vmem %s3746_s0, %s2748_s29 [#allocation2]  }
  0x69   : > { %429 = sbr.rel (!%p426_p0) target bundleno = 98 (0x62), region = 242 }
  0x6e PF: > { %p2750_p1 = scmp.ge.s32.totalorder %s3447_s15, 1  ;;  %p623_p2 = scmp.lt.s32.totalorder %s3447_s15, 5 }
  0x70   : > { %p624_p3 = pnand %p2750_p1, %p623_p2 }
  0x71   : > { %s630_s28 = sand.u32 (!%p624_p3), 1, %s3439_s13  }
  0x72   : > { %627 = sbr.rel (%p624_p3) target bundleno = 1272 (0x4f8), region = 118  ;;  %s2751_s23 = sshll.u32 (!%p624_p3), %s630_s28, 6 }
  0x73   : > { %s3100_s25 = smul.u32 (!%p624_p3), 192, %s630_s28 }
  0x75   : > { %s3809_s15 = scalar_lea.vmem (!%p624_p3), [#allocation2], %s3100_s25  ;;  %s4533_s25 = scalar_lea.vmem (!%p624_p3), [#allocation3], %s2751_s23  }
  0x77   : > { %v729_v42 = vld [vmem:[%s4613_s1 + $0x20] sm:$0x33]  ;;  %vm954_vm0 = vcmask 1040384   ;;  %vm955_vm1 = vcmask 1041408   ;;  %v3513_v44 = vmov 65535   ;;  %vm881_vm2 = vcmask 285696  }
  0x78   : > { %v869_v43 = vunpack.c.l.b16 %v729_v42  ;;  %v956_v45 = vsel %vm954_vm0, 4294967295, %v3513_v44  ;;  %v870_v46 = vunpack.c.h.b16 %v729_v42  ;;  %v2858_v50 = vld [vmem:[%s4613_s1 + $0x10] sm:$0xf]  ;;  %v3069_v51 = vld [vmem:[%s4613_s1 + $0x14] sm:$0xf0]  ;;  %v3042_v0 = vld [vmem:[%s3809_s15] sm:$0xff]  ;;  %v1366_v21 = vlaneseq }
  0x79   : > { %v957_v47 = vsel %vm955_vm1, %v956_v45, 0  ;;  %v3068_v52 = vld [vmem:[%s4613_s1 + $0x14] sm:$0xf]  ;;  %v2860_v53 = vld [vmem:[%s4613_s1 + $0x18] sm:$0xf0]  ;;  %v2859_v56 = vor.u32 %v3069_v51, %v2858_v50  ;;  %v3043_v2 = vld [vmem:[%s3809_s15 + $0x8] sm:$0xff] }
  0x7a   : > { %v875_v48 = vpack.c.b16 %v869_v43, %v869_v43  ;;  %v876_v49 = vpack.c.b16 %v870_v46, %v870_v46  ;;  %v2863_v57 = vor.u32 %v3068_v52, %v2860_v53  ;;  %v2850_v58 = vld [vmem:[%s4613_s1] sm:$0xf]  ;;  %v3067_v59 = vld [vmem:[%s4613_s1 + $0x4] sm:$0xf0]  ;;  %v3066_v60 = vld [vmem:[%s4613_s1 + $0x4] sm:$0xf] }
  0x7b   : > { %v2852_v61 = vld [vmem:[%s4613_s1 + $0x8] sm:$0xf0]  ;;  %v2851_v62 = vor.u32 %v3067_v59, %v2850_v58  ;;  %v3065_v1 = vld [vmem:[%s3809_s15 + $0xb8] sm:$0xff]  ;;  %v3044_v3 = vld [vmem:[%s3809_s15 + $0x10] sm:$0xff]  ;;  %v3873_v26 = vand.u32 127, %v1366_v21  ;;  %vm1850_vm4 = vcmask 523264  }
  0x7c   : > { %v959_v54 = vand.u32 %v957_v47, %v875_v48  ;;  %v962_v55 = vand.u32 %v957_v47, %v876_v49  ;;  %v2855_v63 = vor.u32 %v3066_v60, %v2852_v61  ;;  %v3045_v4 = vld [vmem:[%s3809_s15 + $0x18] sm:$0xff]  ;;  %v3046_v5 = vld [vmem:[%s3809_s15 + $0x20] sm:$0xff]  ;;  %v3047_v6 = vld [vmem:[%s3809_s15 + $0x28] sm:$0xff]  ;;  %vm2418_vm5 = vcmask 31744   ;;  %s3025_s13 = sshll.u32 (%p3600_p5), %s3585_s16, 3  ;;  %s3090_s28 = sshll.u32 (%p3600_p5), %s3585_s16, 6 }
  0x7d   : > { %v3077_v7 = vld [vmem:[%s4615_s3 + $0x38] sm:$0xff]  ;;  %v3076_v8 = vld [vmem:[%s4615_s3 + $0x30] sm:$0xff]  ;;  %v3075_v9 = vld [vmem:[%s4615_s3 + $0x28] sm:$0xff]  ;;  %vm1368_vm3 = vcmp.ge.s32.totalorder %v3873_v26, 64  ;;  %s2435_s20 = ssub.s32 (%p3600_p5), 25, %s3025_s13  ;;  %s4558_s12 = scalar_lea.vmem (%p3600_p5), %s4622_s10, %s3090_s28  }
  0x7e   : > { %969 = vmatpush.bf16.msra.mxu0 %v959_v54  ;;  %1098 = vmatpush.bf16.msra.mxu1 %v962_v55  ;;  %v3048_v10 = vld [vmem:[%s3809_s15 + $0x30] sm:$0xff]  ;;  %v3074_v11 = vld [vmem:[%s4615_s3 + $0x20] sm:$0xff]  ;;  %v3073_v12 = vld [vmem:[%s4615_s3 + $0x18] sm:$0xff]  ;;  %p2436_p4 = scmp.lt.s32.totalorder (%p3600_p5), %s2435_s20, 8 }
  0x7f   : > { %3093 = vmatpush.bf16.msra.mxu3 %v959_v54  ;;  %1565 = vmatpush.bf16.msra.mxu2 %v3077_v7  ;;  %v3072_v13 = vld [vmem:[%s4615_s3 + $0x10] sm:$0xff]  ;;  %v3071_v14 = vld [vmem:[%s4615_s3 + $0x8] sm:$0xff]  ;;  %v3049_v15 = vld [vmem:[%s3809_s15 + $0x38] sm:$0xff] }
  0x80   : > { %v3070_v16 = vld [vmem:[%s4615_s3] sm:$0xff]  ;;  %v3051_v39 = vld [vmem:[%s3809_s15 + $0x48] sm:$0xff] }
  0x81   : > { %v730_v17 = vld [vmem:[%s4614_s2] sm:$0x3] }
  0x82   : > { %970 = vmatpush.bf16.msra.mxu0 %v2859_v56  ;;  %1099 = vmatpush.bf16.msra.mxu1 %v2863_v57  ;;  %v3865_v18 = vperm.slane %v730_v17, 0  ;;  %v3050_v19 = vld [vmem:[%s3809_s15 + $0x40] sm:$0xff]  ;;  %v3869_v24 = vperm.slane %v730_v17, 1 }
  0x83   : > { %3094 = vmatpush.bf16.msra.mxu3 %v2859_v56  ;;  %1566 = vmatpush.bf16.msra.mxu2 %v3076_v8 }
  0x86   : > { %971 = vmatpush.bf16.msra.mxu0 %v2851_v62  ;;  %1100 = vmatpush.bf16.msra.mxu1 %v2855_v63 }
  0x87   : > { %3095 = vmatpush.bf16.msra.mxu3 %v2851_v62  ;;  %1567 = vmatpush.bf16.msra.mxu2 %v3075_v9  ;;  %v3052_v62 = vld [vmem:[%s3809_s15 + $0x50] sm:$0xff] }
  0x89   : > { %2864 = vmatmul.msk.bf16.vlgmr.msra.gmra.mxu0 %vm881_vm2, %v3042_v0  ;;  %2888 = vmatmul.msk.bf16.vlgmr.msra.gmra.mxu1 %vm881_vm2, %v3042_v0 }
  0x8a   : > { %2887 = vmatmul.msk.bf16.vlgmr.msra.gmra.mxu3 %vm881_vm2, %v3065_v1 }
  0x8b   : > { %3096 = vmatpush.bf16.msrb.mxu3 %v962_v55  ;;  %1568 = vmatpush.bf16.msra.mxu2 %v3074_v11 }
  0x8f   : > { %3097 = vmatpush.bf16.msrb.mxu3 %v2863_v57  ;;  %1569 = vmatpush.bf16.msra.mxu2 %v3073_v12 }
  0x93   : > { %3098 = vmatpush.bf16.msrb.mxu3 %v2855_v63  ;;  %1570 = vmatpush.bf16.msra.mxu2 %v3072_v13 }
  0x97   : > { %1571 = vmatpush.bf16.msra.mxu2 %v3071_v14 }
  0x99   : > { %2865 = vmatmul.msk.bf16.gmra.mxu0 %vm881_vm2, %v3043_v2  ;;  %2889 = vmatmul.msk.bf16.gmra.mxu1 %vm881_vm2, %v3043_v2 }
  0x9a   : > { %2911 = vmatmul.msk.bf16.vlgmr.msrb.gmra.mxu3 %vm881_vm2, %v3065_v1 }
  0x9b   : > { %1572 = vmatpush.bf16.msra.mxu2 %v3070_v16 }
  0xa9   : > { %2866 = vmatmul.msk.bf16.gmra.mxu0 %vm881_vm2, %v3044_v3  ;;  %2890 = vmatmul.msk.bf16.gmra.mxu1 %vm881_vm2, %v3044_v3 }
  0xb9   : > { %2867 = vmatmul.msk.bf16.gmra.mxu0 %vm881_vm2, %v3045_v4  ;;  %2891 = vmatmul.msk.bf16.gmra.mxu1 %vm881_vm2, %v3045_v4 }
  0xc9   : > { %2868 = vmatmul.msk.bf16.gmra.mxu0 %vm881_vm2, %v3046_v5  ;;  %2892 = vmatmul.msk.bf16.gmra.mxu1 %vm881_vm2, %v3046_v5 }
  0xd9   : > { %2869 = vmatmul.msk.bf16.gmra.mxu0 %vm881_vm2, %v3047_v6  ;;  %2893 = vmatmul.msk.bf16.gmra.mxu1 %vm881_vm2, %v3047_v6 }
  0xe9   : > { %2870 = vmatmul.msk.bf16.gmra.mxu0 %vm881_vm2, %v3048_v10  ;;  %2894 = vmatmul.msk.bf16.gmra.mxu1 %vm881_vm2, %v3048_v10 }
  0xf9   : > { %2871 = vmatmul.msk.bf16.gmra.mxu0 %vm881_vm2, %v3049_v15  ;;  %2895 = vmatmul.msk.bf16.gmra.mxu1 %vm881_vm2, %v3049_v15 }
 0x106   : > { %v973_v20 = vpop.f32.mrf.mxu0  ;;  %v1102_v22 = vpop.f32.mrf.mxu1 }
 0x107   : > { %v974_v23 = vadd.f32 %v973_v20, %v3865_v18  ;;  %v1103_v27 = vadd.f32 %v1102_v22, %v3869_v24 }
 0x109   : > { %v1222_v25 = vmul.f32 0.01, %v974_v23  ;;  %2872 = vmatmul.msk.bf16.gmra.mxu0 %vm881_vm2, %v3050_v19  ;;  %2896 = vmatmul.msk.bf16.gmra.mxu1 %vm881_vm2, %v3050_v19  ;;  %3264 = vtanh.f32 %v1103_v27  ;;  %v3053_v27 = vld [vmem:[%s3809_s15 + $0x58] sm:$0xff] }
 0x10b   : > { %v3876_v28 = vmax.f32 %v974_v23, %v1222_v25 }
 0x10d   : > { %v3884_v33 = vsel %vm1368_vm3, %v3876_v28, 0.0  ;;  %v1088_v50 = vpop.f32.mrf.mxu3 }
 0x10e   : > { %v975_v29 = vpop.f32.mrf.mxu0  ;;  %v1104_v30 = vpop.f32.mrf.mxu1  ;;  %v1377_v36 = vsub.f32 %v3876_v28, %v3884_v33  ;;  %v1089_v19 = vadd.f32 %v1088_v50, %v3865_v18 }
 0x10f   : > { %v976_v31 = vadd.f32 %v975_v29, %v3865_v18  ;;  %v1105_v32 = vadd.f32 %v1104_v30, %v3869_v24  ;;  %v3265_v37 = vpop.eup %3264 }
 0x110   : > { %v1425_v45 = vmul.f32 %v3265_v37, %v1377_v36  ;;  %v1268_v29 = vmul.f32 0.01, %v1089_v19 }
 0x111   : > { %v1223_v34 = vmul.f32 0.01, %v976_v31  ;;  %3266 = vtanh.f32 %v1105_v32 }
 0x113   : > { %v3886_v35 = vmax.f32 %v976_v31, %v1223_v34 }
 0x115   : > { %v3893_v38 = vsel %vm1368_vm3, %v3886_v35, 0.0  ;;  %v3921_v63 = vpop.f32.mrf.mxu3 }
 0x116   : > { %v978_v40 = vpop.f32.mrf.mxu0  ;;  %v1107_v41 = vpop.f32.mrf.mxu1  ;;  %v1378_v42 = vsub.f32 %v3886_v35, %v3893_v38 }
 0x117   : > { %v3267_v43 = vpop.eup %3266  ;;  %v979_v44 = vadd.f32 %v978_v40, %v3865_v18  ;;  %v1108_v49 = vadd.f32 %v1107_v41, %v3869_v24  ;;  %v1316_v41 = vmax.f32 %v1089_v19, %v1268_v29 }
 0x118   : > { %v1426_v46 = vmul.f32 %v3267_v43, %v1378_v42 }
 0x119   : > { %v1224_v47 = vmul.f32 0.01, %v979_v44  ;;  %2873 = vmatmul.msk.bf16.gmra.mxu0 %vm881_vm2, %v3051_v39  ;;  %2897 = vmatmul.msk.bf16.gmra.mxu1 %vm881_vm2, %v3051_v39  ;;  %3268 = vtanh.f32 %v1108_v49 }
 0x11a   : > { %v1473_v48 = vpack.c.bf16 %v1426_v46, %v1425_v45 }
 0x11b   : > { %v3902_v51 = vmax.f32 %v979_v44, %v1224_v47 }
 0x11c   : > { %1573 = vmatmul.bf16.vlgmr.msra.gmra.mxu2 %v1473_v48 }
 0x11d   : > { %v3909_v56 = vsel %vm1368_vm3, %v3902_v51, 0.0  ;;  %v1217_v15 = vpop.f32.mrf.mxu3 }
 0x11e   : > { %v980_v52 = vpop.f32.mrf.mxu0  ;;  %v1109_v53 = vpop.f32.mrf.mxu1  ;;  %v1379_v59 = vsub.f32 %v3902_v51, %v3909_v56  ;;  %v1218_v21 = vadd.f32 %v1217_v15, %v3869_v24 }
 0x11f   : > { %v981_v54 = vadd.f32 %v980_v52, %v3865_v18  ;;  %v1110_v55 = vadd.f32 %v1109_v53, %v3869_v24  ;;  %v3269_v60 = vpop.eup %3268 }
 0x120   : > { %v1427_v5 = vmul.f32 %v3269_v60, %v1379_v59 }
 0x121   : > { %v1225_v57 = vmul.f32 0.01, %v981_v54  ;;  %3270 = vtanh.f32 %v1110_v55 }
 0x123   : > { %v3911_v58 = vmax.f32 %v981_v54, %v1225_v57 }
 0x125   : > { %v3918_v61 = vsel %vm1368_vm3, %v3911_v58, 0.0 }
 0x126   : > { %v983_v0 = vpop.f32.mrf.mxu0  ;;  %v1112_v1 = vpop.f32.mrf.mxu1  ;;  %v1380_v2 = vsub.f32 %v3911_v58, %v3918_v61 }
 0x127   : > { %v3271_v3 = vpop.eup %3270  ;;  %v984_v4 = vadd.f32 %v983_v0, %v3865_v18  ;;  %v1113_v9 = vadd.f32 %v1112_v1, %v3869_v24 }
 0x128   : > { %v1428_v6 = vmul.f32 %v3271_v3, %v1380_v2 }
 0x129   : > { %v1226_v7 = vmul.f32 0.01, %v984_v4  ;;  %2874 = vmatmul.msk.bf16.gmra.mxu0 %vm881_vm2, %v3052_v62  ;;  %2898 = vmatmul.msk.bf16.gmra.mxu1 %vm881_vm2, %v3052_v62  ;;  %3272 = vtanh.f32 %v1113_v9  ;;  %v3054_v62 = vld [vmem:[%s3809_s15 + $0x60] sm:$0xff] }
 0x12a   : > { %v1474_v8 = vpack.c.bf16 %v1428_v6, %v1427_v5 }
 0x12b   : > { %v3929_v10 = vmax.f32 %v984_v4, %v1226_v7 }
 0x12c   : > { %1578 = vmatmul.bf16.gmra.mxu2 %v1474_v8 }
 0x12d   : > { %v3936_v16 = vsel %vm1368_vm3, %v3929_v10, 0.0 }
 0x12e   : > { %v985_v11 = vpop.f32.mrf.mxu0  ;;  %v1114_v12 = vpop.f32.mrf.mxu1  ;;  %v1381_v22 = vsub.f32 %v3929_v10, %v3936_v16 }
 0x12f   : > { %v986_v13 = vadd.f32 %v985_v11, %v3865_v18  ;;  %v1115_v14 = vadd.f32 %v1114_v12, %v3869_v24  ;;  %v3273_v23 = vpop.eup %3272 }
 0x130   : > { %v1429_v37 = vmul.f32 %v3273_v23, %v1381_v22  ;;  %v3055_v22 = vld [vmem:[%s3809_s15 + $0x68] sm:$0xff] }
 0x131   : > { %v1227_v17 = vmul.f32 0.01, %v986_v13  ;;  %3274 = vtanh.f32 %v1115_v14 }
 0x132   : > { %3276 = vtanh.f32 %v1218_v21 }
 0x133   : > { %v3939_v20 = vmax.f32 %v986_v13, %v1227_v17 }
 0x135   : > { %v3947_v25 = vsel %vm1368_vm3, %v3939_v20, 0.0 }
 0x136   : > { %v988_v30 = vpop.f32.mrf.mxu0  ;;  %v1117_v31 = vpop.f32.mrf.mxu1  ;;  %v1382_v32 = vsub.f32 %v3939_v20, %v3947_v25 }
 0x137   : > { %v3275_v34 = vpop.eup %3274  ;;  %v989_v36 = vadd.f32 %v988_v30, %v3865_v18  ;;  %v1118_v44 = vadd.f32 %v1117_v31, %v3869_v24 }
 0x138   : > { %v1430_v39 = vmul.f32 %v3275_v34, %v1382_v32  ;;  %v3277_v45 = vpop.eup %3276 }
 0x139   : > { %v1228_v40 = vmul.f32 0.01, %v989_v36  ;;  %2875 = vmatmul.msk.bf16.gmra.mxu0 %vm881_vm2, %v3053_v27  ;;  %2899 = vmatmul.msk.bf16.gmra.mxu1 %vm881_vm2, %v3053_v27  ;;  %3278 = vtanh.f32 %v1118_v44 }
 0x13a   : > { %v1475_v42 = vpack.c.bf16 %v1430_v39, %v1429_v37 }
 0x13b   : > { %v3955_v43 = vmax.f32 %v989_v36, %v1228_v40 }
 0x13c   : > { %1583 = vmatmul.bf16.gmra.mxu2 %v1475_v42 }
 0x13d   : > { %v3961_v46 = vsel %vm1368_vm3, %v3955_v43, 0.0 }
 0x13e   : > { %v990_v47 = vpop.f32.mrf.mxu0  ;;  %v1119_v48 = vpop.f32.mrf.mxu1  ;;  %v1423_v49 = vsub.f32 %v1316_v41, %v3961_v46  ;;  %v1383_v57 = vsub.f32 %v3955_v43, %v3961_v46 }
 0x13f   : > { %v991_v50 = vadd.f32 %v990_v47, %v3865_v18  ;;  %v1120_v52 = vadd.f32 %v1119_v48, %v3869_v24  ;;  %v3279_v59 = vpop.eup %3278 }
 0x140   : > { %v3966_v53 = vmul.f32 %v3277_v45, %v1423_v49  ;;  %v1431_v5 = vmul.f32 %v3279_v59, %v1383_v57 }
 0x141   : > { %v1229_v54 = vmul.f32 0.01, %v991_v50  ;;  %3280 = vtanh.f32 %v1120_v52  ;;  %v3056_v52 = vld [vmem:[%s3809_s15 + $0x70] sm:$0xff] }
 0x143   : > { %v3968_v55 = vmax.f32 %v991_v50, %v1229_v54 }
 0x145   : > { %v3975_v60 = vsel %vm1368_vm3, %v3968_v55, 0.0 }
 0x146   : > { %v993_v0 = vpop.f32.mrf.mxu0  ;;  %v1122_v1 = vpop.f32.mrf.mxu1  ;;  %v1384_v2 = vsub.f32 %v3968_v55, %v3975_v60 }
 0x147   : > { %v3281_v3 = vpop.eup %3280  ;;  %v994_v4 = vadd.f32 %v993_v0, %v3865_v18  ;;  %v1123_v26 = vadd.f32 %v1122_v1, %v3869_v24 }
 0x148   : > { %v1432_v6 = vmul.f32 %v3281_v3, %v1384_v2 }
 0x149   : > { %2876 = vmatmul.msk.bf16.gmra.mxu0 %vm881_vm2, %v3054_v62  ;;  %2900 = vmatmul.msk.bf16.gmra.mxu1 %vm881_vm2, %v3054_v62  ;;  %v1230_v8 = vmul.f32 0.01, %v994_v4  ;;  %3282 = vtanh.f32 %v1123_v26 }
 0x14a   : > { %v1476_v7 = vpack.c.bf16 %v1432_v6, %v1431_v5 }
 0x14b   : > { %v1278_v14 = vmax.f32 %v994_v4, %v1230_v8 }
 0x14c   : > { %1588 = vmatmul.bf16.gmra.mxu2 %v1476_v7 }
 0x14d   : > { %v1385_v19 = vsub.f32 %v1278_v14, %v3884_v33 }
 0x14e   : > { %v995_v9 = vpop.f32.mrf.mxu0  ;;  %v1124_v11 = vpop.f32.mrf.mxu1 }
 0x14f   : > { %v996_v12 = vadd.f32 %v995_v9, %v3865_v18  ;;  %v1125_v13 = vadd.f32 %v1124_v11, %v3869_v24  ;;  %v3283_v21 = vpop.eup %3282 }
 0x150   : > { %v1433_v32 = vmul.f32 %v3283_v21, %v1385_v19 }
 0x151   : > { %v1231_v15 = vmul.f32 0.01, %v996_v12  ;;  %3284 = vtanh.f32 %v1125_v13 }
 0x153   : > { %v1279_v17 = vmax.f32 %v996_v12, %v1231_v15  ;;  %v3057_v15 = vld [vmem:[%s3809_s15 + $0x78] sm:$0xff] }
 0x155   : > { %v1386_v23 = vsub.f32 %v1279_v17, %v3893_v38 }
 0x156   : > { %v998_v27 = vpop.f32.mrf.mxu0  ;;  %v1127_v29 = vpop.f32.mrf.mxu1 }
 0x157   : > { %v3285_v30 = vpop.eup %3284  ;;  %v999_v31 = vadd.f32 %v998_v27, %v3865_v18  ;;  %v1128_v37 = vadd.f32 %v1127_v29, %v3869_v24 }
 0x158   : > { %v1434_v34 = vmul.f32 %v3285_v30, %v1386_v23 }
 0x159   : > { %2877 = vmatmul.msk.bf16.gmra.mxu0 %vm881_vm2, %v3055_v22  ;;  %2901 = vmatmul.msk.bf16.gmra.mxu1 %vm881_vm2, %v3055_v22  ;;  %v1232_v39 = vmul.f32 0.01, %v999_v31  ;;  %3286 = vtanh.f32 %v1128_v37 }
 0x15a   : > { %v1477_v36 = vpack.c.bf16 %v1434_v34, %v1433_v32 }
 0x15b   : > { %v1280_v45 = vmax.f32 %v999_v31, %v1232_v39 }
 0x15c   : > { %1593 = vmatmul.bf16.gmra.mxu2 %v1477_v36 }
 0x15d   : > { %v1387_v49 = vsub.f32 %v1280_v45, %v3909_v56  ;;  %v3080_v45 = vld [vmem:[%s4617_s5 + $0x10] sm:$0xff] }
 0x15e   : > { %v1000_v40 = vpop.f32.mrf.mxu0  ;;  %v1129_v41 = vpop.f32.mrf.mxu1 }
 0x15f   : > { %v1001_v42 = vadd.f32 %v1000_v40, %v3865_v18  ;;  %v1130_v44 = vadd.f32 %v1129_v41, %v3869_v24  ;;  %v3287_v50 = vpop.eup %3286  ;;  %v3081_v40 = vld [vmem:[%s4617_s5 + $0x18] sm:$0xff] }
 0x160   : > { %v1435_v1 = vmul.f32 %v3287_v50, %v1387_v49  ;;  %1927 = vmatpush.bf16.msra.mxu3 %v3081_v40  ;;  %v3058_v49 = vld [vmem:[%s3809_s15 + $0x80] sm:$0xff] }
 0x161   : > { %v1233_v47 = vmul.f32 0.01, %v1001_v42  ;;  %3288 = vtanh.f32 %v1130_v44 }
 0x163   : > { %v1281_v48 = vmax.f32 %v1001_v42, %v1233_v47 }
 0x164   : > { %1928 = vmatpush.bf16.msra.mxu3 %v3080_v45 }
 0x165   : > { %v1388_v54 = vsub.f32 %v1281_v48, %v3918_v61 }
 0x166   : > { %v1003_v57 = vpop.f32.mrf.mxu0  ;;  %v1132_v59 = vpop.f32.mrf.mxu1 }
 0x167   : > { %v3289_v62 = vpop.eup %3288  ;;  %v1004_v0 = vadd.f32 %v1003_v57, %v3865_v18  ;;  %v1133_v4 = vadd.f32 %v1132_v59, %v3869_v24  ;;  %v3079_v59 = vld [vmem:[%s4617_s5 + $0x8] sm:$0xff] }
 0x168   : > { %v1436_v2 = vmul.f32 %v3289_v62, %v1388_v54  ;;  %1929 = vmatpush.bf16.msra.mxu3 %v3079_v59 }
 0x169   : > { %2878 = vmatmul.msk.bf16.gmra.mxu0 %vm881_vm2, %v3056_v52  ;;  %2902 = vmatmul.msk.bf16.gmra.mxu1 %vm881_vm2, %v3056_v52  ;;  %v1234_v5 = vmul.f32 0.01, %v1004_v0  ;;  %3290 = vtanh.f32 %v1133_v4  ;;  %v3078_v4 = vld [vmem:[%s4617_s5] sm:$0xff] }
 0x16a   : > { %v1478_v3 = vpack.c.bf16 %v1436_v2, %v1435_v1 }
 0x16b   : > { %v1282_v9 = vmax.f32 %v1004_v0, %v1234_v5 }
 0x16c   : > { %1598 = vmatmul.bf16.gmra.mxu2 %v1478_v3  ;;  %1930 = vmatpush.bf16.msra.mxu3 %v3078_v4 }
 0x16d   : > { %v1389_v13 = vsub.f32 %v1282_v9, %v3936_v16 }
 0x16e   : > { %v1005_v6 = vpop.f32.mrf.mxu0  ;;  %v1134_v7 = vpop.f32.mrf.mxu1 }
 0x16f   : > { %v1006_v26 = vadd.f32 %v1005_v6, %v3865_v18  ;;  %v1135_v8 = vadd.f32 %v1134_v7, %v3869_v24  ;;  %v3291_v14 = vpop.eup %3290 }
 0x170   : > { %v1437_v27 = vmul.f32 %v3291_v14, %v1389_v13 }
 0x171   : > { %v1235_v11 = vmul.f32 0.01, %v1006_v26  ;;  %3292 = vtanh.f32 %v1135_v8 }
 0x173   : > { %v1283_v12 = vmax.f32 %v1006_v26, %v1235_v11 }
 0x175   : > { %v1390_v17 = vsub.f32 %v1283_v12, %v3947_v25 }
 0x176   : > { %v1008_v19 = vpop.f32.mrf.mxu0  ;;  %v1137_v21 = vpop.f32.mrf.mxu1 }
 0x177   : > { %v3293_v22 = vpop.eup %3292  ;;  %v1009_v23 = vadd.f32 %v1008_v19, %v3865_v18  ;;  %v1138_v31 = vadd.f32 %v1137_v21, %v3869_v24 }
 0x178   : > { %v1438_v29 = vmul.f32 %v3293_v22, %v1390_v17 }
 0x179   : > { %2879 = vmatmul.msk.bf16.gmra.mxu0 %vm881_vm2, %v3057_v15  ;;  %2903 = vmatmul.msk.bf16.gmra.mxu1 %vm881_vm2, %v3057_v15  ;;  %v1236_v32 = vmul.f32 0.01, %v1009_v23  ;;  %3294 = vtanh.f32 %v1138_v31  ;;  %v3059_v15 = vld [vmem:[%s3809_s15 + $0x88] sm:$0xff] }
 0x17a   : > { %v1479_v30 = vpack.c.bf16 %v1438_v29, %v1437_v27 }
 0x17b   : > { %v1284_v41 = vmax.f32 %v1009_v23, %v1236_v32 }
 0x17c   : > { %1603 = vmatmul.bf16.gmra.mxu2 %v1479_v30 }
 0x17d   : > { %v1391_v47 = vsub.f32 %v1284_v41, %v3961_v46 }
 0x17e   : > { %v1010_v34 = vpop.f32.mrf.mxu0  ;;  %v1139_v36 = vpop.f32.mrf.mxu1 }
 0x17f   : > { %v1011_v37 = vadd.f32 %v1010_v34, %v3865_v18  ;;  %v1140_v39 = vadd.f32 %v1139_v36, %v3869_v24  ;;  %v3295_v48 = vpop.eup %3294 }
 0x180   : > { %v1439_v0 = vmul.f32 %v3295_v48, %v1391_v47 }
 0x181   : > { %v1237_v42 = vmul.f32 0.01, %v1011_v37  ;;  %3296 = vtanh.f32 %v1140_v39 }
 0x183   : > { %v1285_v44 = vmax.f32 %v1011_v37, %v1237_v42  ;;  %v4046_v42 = vld [vmem:[%s4616_s4] ss:$0 sm:$0xff] }
 0x185   : > { %v1392_v50 = vsub.f32 %v1285_v44, %v3975_v60 }
 0x186   : > { %v1013_v52 = vpop.f32.mrf.mxu0  ;;  %v1142_v54 = vpop.f32.mrf.mxu1 }
 0x187   : > { %v3297_v57 = vpop.eup %3296  ;;  %v1014_v62 = vadd.f32 %v1013_v52, %v3865_v18  ;;  %v1143_v3 = vadd.f32 %v1142_v54, %v3869_v24 }
 0x188   : > { %v1440_v1 = vmul.f32 %v3297_v57, %v1392_v50  ;;  %v3060_v50 = vld [vmem:[%s3809_s15 + $0x90] sm:$0xff] }
 0x189   : > { %2880 = vmatmul.msk.bf16.gmra.mxu0 %vm881_vm2, %v3058_v49  ;;  %2904 = vmatmul.msk.bf16.gmra.mxu1 %vm881_vm2, %v3058_v49  ;;  %v1238_v5 = vmul.f32 0.01, %v1014_v62  ;;  %3298 = vtanh.f32 %v1143_v3 }
 0x18a   : > { %v1480_v2 = vpack.c.bf16 %v1440_v1, %v1439_v0 }
 0x18b   : > { %v1286_v9 = vmax.f32 %v1014_v62, %v1238_v5 }
 0x18c   : > { %1608 = vmatmul.bf16.gmra.mxu2 %v1480_v2 }
 0x18d   : > { %v1393_v13 = vsub.f32 %v1286_v9, %v3884_v33 }
 0x18e   : > { %v1015_v6 = vpop.f32.mrf.mxu0  ;;  %v1144_v7 = vpop.f32.mrf.mxu1 }
 0x18f   : > { %v1016_v26 = vadd.f32 %v1015_v6, %v3865_v18  ;;  %v1145_v8 = vadd.f32 %v1144_v7, %v3869_v24  ;;  %v3299_v14 = vpop.eup %3298 }
 0x190   : > { %v1441_v27 = vmul.f32 %v3299_v14, %v1393_v13 }
 0x191   : > { %v1239_v11 = vmul.f32 0.01, %v1016_v26  ;;  %3300 = vtanh.f32 %v1145_v8 }
 0x193   : > { %v1287_v12 = vmax.f32 %v1016_v26, %v1239_v11 }
 0x195   : > { %v1394_v17 = vsub.f32 %v1287_v12, %v3893_v38 }
 0x196   : > { %v1018_v19 = vpop.f32.mrf.mxu0  ;;  %v1147_v21 = vpop.f32.mrf.mxu1 }
 0x197   : > { %v3301_v22 = vpop.eup %3300  ;;  %v1019_v23 = vadd.f32 %v1018_v19, %v3865_v18  ;;  %v1148_v31 = vadd.f32 %v1147_v21, %v3869_v24 }
 0x198   : > { %v1442_v29 = vmul.f32 %v3301_v22, %v1394_v17 }
 0x199   : > { %2881 = vmatmul.msk.bf16.gmra.mxu0 %vm881_vm2, %v3059_v15  ;;  %2905 = vmatmul.msk.bf16.gmra.mxu1 %vm881_vm2, %v3059_v15  ;;  %v1240_v32 = vmul.f32 0.01, %v1019_v23  ;;  %3302 = vtanh.f32 %v1148_v31 }
 0x19a   : > { %v1481_v30 = vpack.c.bf16 %v1442_v29, %v1441_v27 }
 0x19b   : > { %v1288_v41 = vmax.f32 %v1019_v23, %v1240_v32 }
 0x19c   : > { %1613 = vmatmul.bf16.gmra.mxu2 %v1481_v30  ;;  %v3061_v30 = vld [vmem:[%s3809_s15 + $0x98] sm:$0xff] }
 0x19d   : > { %v1395_v47 = vsub.f32 %v1288_v41, %v3909_v56 }
 0x19e   : > { %v1020_v34 = vpop.f32.mrf.mxu0  ;;  %v1149_v36 = vpop.f32.mrf.mxu1 }
 0x19f   : > { %v1021_v37 = vadd.f32 %v1020_v34, %v3865_v18  ;;  %v1150_v39 = vadd.f32 %v1149_v36, %v3869_v24  ;;  %v1574_v40 = vpop.f32.mrf.mxu2  ;;  %v3303_v49 = vpop.eup %3302 }
 0x1a0   : > { %v1575_v48 = vadd.f32 %v4046_v42, %v1574_v40  ;;  %v1443_v3 = vmul.f32 %v3303_v49, %v1395_v47 }
 0x1a1   : > { %v1241_v44 = vmul.f32 0.01, %v1021_v37  ;;  %3304 = vtanh.f32 %v1150_v39 }
 0x1a2   : > { %v1694_v1 = vmul.f32 0.01, %v1575_v48 }
 0x1a3   : > { %v1289_v45 = vmax.f32 %v1021_v37, %v1241_v44 }
 0x1a4   : > { %v1742_v8 = vmax.f32 %v1575_v48, %v1694_v1 }
 0x1a5   : > { %v1396_v52 = vsub.f32 %v1289_v45, %v3918_v61 }
 0x1a6   : > { %v1023_v54 = vpop.f32.mrf.mxu0  ;;  %v1152_v57 = vpop.f32.mrf.mxu1 }
 0x1a7   : > { %v3305_v59 = vpop.eup %3304  ;;  %v1024_v62 = vadd.f32 %v1023_v54, %v3865_v18  ;;  %v1576_v0 = vpop.f32.mrf.mxu2  ;;  %v1153_v5 = vadd.f32 %v1152_v57, %v3869_v24 }
 0x1a8   : > { %v1577_v2 = vadd.f32 %v4046_v42, %v1576_v0  ;;  %v1444_v4 = vmul.f32 %v3305_v59, %v1396_v52 }
 0x1a9   : > { %2882 = vmatmul.msk.bf16.gmra.mxu0 %vm881_vm2, %v3060_v50  ;;  %2906 = vmatmul.msk.bf16.gmra.mxu1 %vm881_vm2, %v3060_v50  ;;  %v1242_v26 = vmul.f32 0.01, %v1024_v62  ;;  %3306 = vtanh.f32 %v1153_v5 }
 0x1aa   : > { %v1695_v6 = vmul.f32 0.01, %v1577_v2  ;;  %v1482_v7 = vpack.c.bf16 %v1444_v4, %v1443_v3 }
 0x1ab   : > { %v1290_v14 = vmax.f32 %v1024_v62, %v1242_v26 }
 0x1ac   : > { %v1743_v9 = vmax.f32 %v1577_v2, %v1695_v6  ;;  %1618 = vmatmul.bf16.gmra.mxu2 %v1482_v7 }
 0x1ad   : > { %v1397_v22 = vsub.f32 %v1290_v14, %v3936_v16 }
 0x1ae   : > { %v1790_v11 = vpack.c.bf16 %v1743_v9, %v1742_v8  ;;  %v1025_v12 = vpop.f32.mrf.mxu0  ;;  %v1154_v13 = vpop.f32.mrf.mxu1  ;;  %v3062_v8 = vld [vmem:[%s3809_s15 + $0xa0] sm:$0xff] }
 0x1af   : > { %v1026_v15 = vadd.f32 %v1025_v12, %v3865_v18  ;;  %v1155_v17 = vadd.f32 %v1154_v13, %v3869_v24  ;;  %v1579_v19 = vpop.f32.mrf.mxu2  ;;  %v3307_v27 = vpop.eup %3306 }
 0x1b0   : > { %2960 = vmatmul.msk.bf16.vlgmr.msra.gmra.mxu3 %vm1850_vm4, %v1790_v11  ;;  %v1580_v29 = vadd.f32 %v4046_v42, %v1579_v19  ;;  %v1445_v39 = vmul.f32 %v3307_v27, %v1397_v22 }
 0x1b1   : > { %v1243_v21 = vmul.f32 0.01, %v1026_v15  ;;  %3308 = vtanh.f32 %v1155_v17 }
 0x1b2   : > { %v1696_v40 = vmul.f32 0.01, %v1580_v29 }
 0x1b3   : > { %v1291_v23 = vmax.f32 %v1026_v15, %v1243_v21 }
 0x1b4   : > { %v1744_v50 = vmax.f32 %v1580_v29, %v1696_v40 }
 0x1b5   : > { %v1398_v31 = vsub.f32 %v1291_v23, %v3947_v25 }
 0x1b6   : > { %v1028_v32 = vpop.f32.mrf.mxu0  ;;  %v1157_v34 = vpop.f32.mrf.mxu1 }
 0x1b7   : > { %v3309_v36 = vpop.eup %3308  ;;  %v1581_v37 = vpop.f32.mrf.mxu2  ;;  %v1029_v41 = vadd.f32 %v1028_v32, %v3865_v18  ;;  %v1158_v49 = vadd.f32 %v1157_v34, %v3869_v24 }
 0x1b8   : > { %v1582_v44 = vadd.f32 %v4046_v42, %v1581_v37  ;;  %v1446_v45 = vmul.f32 %v3309_v36, %v1398_v31 }
 0x1b9   : > { %2883 = vmatmul.msk.bf16.gmra.mxu0 %vm881_vm2, %v3061_v30  ;;  %2907 = vmatmul.msk.bf16.gmra.mxu1 %vm881_vm2, %v3061_v30  ;;  %v1244_v52 = vmul.f32 0.01, %v1029_v41  ;;  %3310 = vtanh.f32 %v1158_v49 }
 0x1ba   : > { %v1697_v47 = vmul.f32 0.01, %v1582_v44  ;;  %v1483_v48 = vpack.c.bf16 %v1446_v45, %v1445_v39 }
 0x1bb   : > { %v1292_v3 = vmax.f32 %v1029_v41, %v1244_v52 }
 0x1bc   : > { %v1745_v54 = vmax.f32 %v1582_v44, %v1697_v47  ;;  %1623 = vmatmul.bf16.gmra.mxu2 %v1483_v48 }
 0x1bd   : > { %v1399_v6 = vsub.f32 %v1292_v3, %v3961_v46 }
 0x1be   : > { %v1030_v57 = vpop.f32.mrf.mxu0  ;;  %v1159_v59 = vpop.f32.mrf.mxu1  ;;  %v1791_v62 = vpack.c.bf16 %v1745_v54, %v1744_v50  ;;  %v3063_v54 = vld [vmem:[%s3809_s15 + $0xa8] sm:$0xff] }
 0x1bf   : > { %v1031_v0 = vadd.f32 %v1030_v57, %v3865_v18  ;;  %v1160_v1 = vadd.f32 %v1159_v59, %v3869_v24  ;;  %v1584_v2 = vpop.f32.mrf.mxu2  ;;  %v3311_v26 = vpop.eup %3310 }
 0x1c0   : > { %2961 = vmatmul.msk.bf16.gmra.mxu3 %vm1850_vm4, %v1791_v62  ;;  %v1585_v7 = vadd.f32 %v4046_v42, %v1584_v2  ;;  %v1447_v21 = vmul.f32 %v3311_v26, %v1399_v6 }
 0x1c1   : > { %v1245_v4 = vmul.f32 0.01, %v1031_v0  ;;  %3312 = vtanh.f32 %v1160_v1 }
 0x1c2   : > { %v1698_v17 = vmul.f32 0.01, %v1585_v7 }
 0x1c3   : > { %v1293_v5 = vmax.f32 %v1031_v0, %v1245_v4 }
 0x1c4   : > { %v1746_v31 = vmax.f32 %v1585_v7, %v1698_v17 }
 0x1c5   : > { %v1400_v9 = vsub.f32 %v1293_v5, %v3975_v60 }
 0x1c6   : > { %v1033_v11 = vpop.f32.mrf.mxu0  ;;  %v1162_v12 = vpop.f32.mrf.mxu1 }
 0x1c7   : > { %v3313_v13 = vpop.eup %3312  ;;  %v1034_v14 = vadd.f32 %v1033_v11, %v3865_v18  ;;  %v1586_v15 = vpop.f32.mrf.mxu2  ;;  %v1163_v23 = vadd.f32 %v1162_v12, %v3869_v24 }
 0x1c8   : > { %v1587_v19 = vadd.f32 %v4046_v42, %v1586_v15  ;;  %v1448_v22 = vmul.f32 %v3313_v13, %v1400_v9 }
 0x1c9   : > { %2884 = vmatmul.msk.bf16.gmra.mxu0 %vm881_vm2, %v3062_v8  ;;  %2908 = vmatmul.msk.bf16.gmra.mxu1 %vm881_vm2, %v3062_v8  ;;  %v1246_v30 = vmul.f32 0.01, %v1034_v14  ;;  %3314 = vtanh.f32 %v1163_v23 }
 0x1ca   : > { %v1699_v27 = vmul.f32 0.01, %v1587_v19  ;;  %v1484_v29 = vpack.c.bf16 %v1448_v22, %v1447_v21 }
 0x1cb   : > { %v1294_v39 = vmax.f32 %v1034_v14, %v1246_v30 }
 0x1cc   : > { %v1747_v32 = vmax.f32 %v1587_v19, %v1699_v27  ;;  %1628 = vmatmul.bf16.gmra.mxu2 %v1484_v29 }
 0x1cd   : > { %v1401_v47 = vsub.f32 %v1294_v39, %v3884_v33 }
 0x1ce   : > { %v1035_v34 = vpop.f32.mrf.mxu0  ;;  %v1164_v36 = vpop.f32.mrf.mxu1  ;;  %v1792_v37 = vpack.c.bf16 %v1747_v32, %v1746_v31  ;;  %v3064_v32 = vld [vmem:[%s3809_s15 + $0xb0] sm:$0xff] }
 0x1cf   : > { %v1036_v40 = vadd.f32 %v1035_v34, %v3865_v18  ;;  %v1165_v41 = vadd.f32 %v1164_v36, %v3869_v24  ;;  %v1589_v44 = vpop.f32.mrf.mxu2  ;;  %v3315_v49 = vpop.eup %3314 }
 0x1d0   : > { %2962 = vmatmul.msk.bf16.gmra.mxu3 %vm1850_vm4, %v1792_v37  ;;  %v1590_v50 = vadd.f32 %v4046_v42, %v1589_v44  ;;  %v1449_v1 = vmul.f32 %v3315_v49, %v1401_v47 }
 0x1d1   : > { %v1247_v45 = vmul.f32 0.01, %v1036_v40  ;;  %3316 = vtanh.f32 %v1165_v41 }
 0x1d2   : > { %v1700_v2 = vmul.f32 0.01, %v1590_v50 }
 0x1d3   : > { %v1295_v48 = vmax.f32 %v1036_v40, %v1247_v45 }
 0x1d4   : > { %v1748_v8 = vmax.f32 %v1590_v50, %v1700_v2 }
 0x1d5   : > { %v1402_v52 = vsub.f32 %v1295_v48, %v3893_v38 }
 0x1d6   : > { %v1038_v57 = vpop.f32.mrf.mxu0  ;;  %v1167_v59 = vpop.f32.mrf.mxu1 }
 0x1d7   : > { %v3317_v62 = vpop.eup %3316  ;;  %v1591_v0 = vpop.f32.mrf.mxu2  ;;  %v1039_v3 = vadd.f32 %v1038_v57, %v3865_v18  ;;  %v1168_v26 = vadd.f32 %v1167_v59, %v3869_v24 }
 0x1d8   : > { %v1592_v4 = vadd.f32 %v4046_v42, %v1591_v0  ;;  %v1450_v5 = vmul.f32 %v3317_v62, %v1402_v52 }
 0x1d9   : > { %2885 = vmatmul.msk.bf16.gmra.mxu0 %vm881_vm2, %v3063_v54  ;;  %2909 = vmatmul.msk.bf16.gmra.mxu1 %vm881_vm2, %v3063_v54  ;;  %v1248_v9 = vmul.f32 0.01, %v1039_v3  ;;  %3318 = vtanh.f32 %v1168_v26 }
 0x1da   : > { %v1701_v6 = vmul.f32 0.01, %v1592_v4  ;;  %v1485_v7 = vpack.c.bf16 %v1450_v5, %v1449_v1 }
 0x1db   : > { %v1296_v21 = vmax.f32 %v1039_v3, %v1248_v9 }
 0x1dc   : > { %v1749_v11 = vmax.f32 %v1592_v4, %v1701_v6  ;;  %1633 = vmatmul.bf16.gmra.mxu2 %v1485_v7 }
 0x1dd   : > { %v1403_v27 = vsub.f32 %v1296_v21, %v3909_v56 }
 0x1de   : > { %v1040_v12 = vpop.f32.mrf.mxu0  ;;  %v1169_v13 = vpop.f32.mrf.mxu1  ;;  %v1793_v14 = vpack.c.bf16 %v1749_v11, %v1748_v8 }
 0x1df   : > { %v1041_v15 = vadd.f32 %v1040_v12, %v3865_v18  ;;  %v1170_v17 = vadd.f32 %v1169_v13, %v3869_v24  ;;  %v1594_v19 = vpop.f32.mrf.mxu2  ;;  %v3319_v30 = vpop.eup %3318 }
 0x1e0   : > { %2963 = vmatmul.msk.bf16.gmra.mxu3 %vm1850_vm4, %v1793_v14  ;;  %v1595_v29 = vadd.f32 %v4046_v42, %v1594_v19  ;;  %v1451_v45 = vmul.f32 %v3319_v30, %v1403_v27 }
 0x1e1   : > { %v1249_v22 = vmul.f32 0.01, %v1041_v15  ;;  %3320 = vtanh.f32 %v1170_v17 }
 0x1e2   : > { %v1702_v41 = vmul.f32 0.01, %v1595_v29 }
 0x1e3   : > { %v1297_v23 = vmax.f32 %v1041_v15, %v1249_v22 }
 0x1e4   : > { %v1750_v54 = vmax.f32 %v1595_v29, %v1702_v41 }
 0x1e5   : > { %v1404_v31 = vsub.f32 %v1297_v23, %v3918_v61 }
 0x1e6   : > { %v1043_v34 = vpop.f32.mrf.mxu0  ;;  %v1172_v36 = vpop.f32.mrf.mxu1 }
 0x1e7   : > { %v3321_v37 = vpop.eup %3320  ;;  %v1044_v39 = vadd.f32 %v1043_v34, %v3865_v18  ;;  %v1596_v40 = vpop.f32.mrf.mxu2  ;;  %v1173_v48 = vadd.f32 %v1172_v36, %v3869_v24  ;;  %v3085_v34 = vld [vmem:[%s4619_s7 + $0x18] sm:$0xff] }
 0x1e8   : > { %v1597_v44 = vadd.f32 %v4046_v42, %v1596_v40  ;;  %v1452_v47 = vmul.f32 %v3321_v37, %v1404_v31  ;;  %2300 = vmatpush.bf16.msrb.mxu0 %v3085_v34 }
 0x1e9   : > { %2886 = vmatmul.msk.bf16.gmra.mxu0 %vm881_vm2, %v3064_v32  ;;  %2910 = vmatmul.msk.bf16.gmra.mxu1 %vm881_vm2, %v3064_v32  ;;  %v1250_v52 = vmul.f32 0.01, %v1044_v39  ;;  %3322 = vtanh.f32 %v1173_v48 }
 0x1ea   : > { %v1703_v49 = vmul.f32 0.01, %v1597_v44  ;;  %v1486_v50 = vpack.c.bf16 %v1452_v47, %v1451_v45 }
 0x1eb   : > { %v1298_v1 = vmax.f32 %v1044_v39, %v1250_v52 }
 0x1ec   : > { %v1751_v57 = vmax.f32 %v1597_v44, %v1703_v49  ;;  %1638 = vmatmul.bf16.gmra.mxu2 %v1486_v50 }
 0x1ed   : > { %v1405_v6 = vsub.f32 %v1298_v1, %v3936_v16 }
 0x1ee   : > { %v1045_v59 = vpop.f32.mrf.mxu0  ;;  %v1174_v62 = vpop.f32.mrf.mxu1  ;;  %v1794_v0 = vpack.c.bf16 %v1751_v57, %v1750_v54 }
 0x1ef   : > { %v1046_v2 = vadd.f32 %v1045_v59, %v3865_v18  ;;  %v1175_v3 = vadd.f32 %v1174_v62, %v3869_v24  ;;  %v1599_v4 = vpop.f32.mrf.mxu2  ;;  %v3323_v26 = vpop.eup %3322 }
 0x1f0   : > { %2964 = vmatmul.msk.bf16.gmra.mxu3 %vm1850_vm4, %v1794_v0  ;;  %v1600_v8 = vadd.f32 %v4046_v42, %v1599_v4  ;;  %v1453_v15 = vmul.f32 %v3323_v26, %v1405_v6 }
 0x1f1   : > { %v1251_v5 = vmul.f32 0.01, %v1046_v2  ;;  %3324 = vtanh.f32 %v1175_v3 }
 0x1f2   : > { %v1704_v17 = vmul.f32 0.01, %v1600_v8 }
 0x1f3   : > { %v1299_v7 = vmax.f32 %v1046_v2, %v1251_v5 }
 0x1f4   : > { %v1752_v30 = vmax.f32 %v1600_v8, %v1704_v17 }
 0x1f5   : > { %v1406_v9 = vsub.f32 %v1299_v7, %v3947_v25 }
 0x1f6   : > { %v1048_v11 = vpop.f32.mrf.mxu0  ;;  %v1177_v12 = vpop.f32.mrf.mxu1 }
 0x1f7   : > { %v3325_v13 = vpop.eup %3324  ;;  %v1601_v14 = vpop.f32.mrf.mxu2  ;;  %v1049_v19 = vadd.f32 %v1048_v11, %v3865_v18  ;;  %v1178_v29 = vadd.f32 %v1177_v12, %v3869_v24 }
 0x1f8   : > { %v1602_v21 = vadd.f32 %v4046_v42, %v1601_v14  ;;  %v1454_v22 = vmul.f32 %v3325_v13, %v1406_v9 }
 0x1f9   : > { %v1252_v31 = vmul.f32 0.01, %v1049_v19  ;;  %3326 = vtanh.f32 %v1178_v29 }
 0x1fa   : > { %v1705_v23 = vmul.f32 0.01, %v1602_v21  ;;  %v1487_v27 = vpack.c.bf16 %v1454_v22, %v1453_v15 }
 0x1fb   : > { %v1300_v45 = vmax.f32 %v1049_v19, %v1252_v31 }
 0x1fc   : > { %v1753_v32 = vmax.f32 %v1602_v21, %v1705_v23  ;;  %1643 = vmatmul.bf16.gmra.mxu2 %v1487_v27 }
 0x1fd   : > { %v1407_v49 = vsub.f32 %v1300_v45, %v3961_v46 }
 0x1fe   : > { %v1050_v36 = vpop.f32.mrf.mxu0  ;;  %v1179_v37 = vpop.f32.mrf.mxu1  ;;  %v1795_v39 = vpack.c.bf16 %v1753_v32, %v1752_v30 }
 0x1ff   : > { %v1051_v40 = vadd.f32 %v1050_v36, %v3865_v18  ;;  %v1180_v41 = vadd.f32 %v1179_v37, %v3869_v24  ;;  %v1604_v44 = vpop.f32.mrf.mxu2  ;;  %v3327_v52 = vpop.eup %3326 }
 0x200   : > { %2965 = vmatmul.msk.bf16.gmra.mxu3 %vm1850_vm4, %v1795_v39  ;;  %v1605_v50 = vadd.f32 %v4046_v42, %v1604_v44  ;;  %v1455_v4 = vmul.f32 %v3327_v52, %v1407_v49 }
 0x201   : > { %v1253_v47 = vmul.f32 0.01, %v1051_v40  ;;  %3328 = vtanh.f32 %v1180_v41 }
 0x202   : > { %v1706_v2 = vmul.f32 0.01, %v1605_v50 }
 0x203   : > { %v1301_v48 = vmax.f32 %v1051_v40, %v1253_v47 }
 0x204   : > { %v1754_v9 = vmax.f32 %v1605_v50, %v1706_v2 }
 0x205   : > { %v1408_v54 = vsub.f32 %v1301_v48, %v3975_v60 }
 0x206   : > { %v1053_v57 = vpop.f32.mrf.mxu0  ;;  %v1182_v59 = vpop.f32.mrf.mxu1 }
 0x207   : > { %v3329_v62 = vpop.eup %3328  ;;  %v1054_v0 = vadd.f32 %v1053_v57, %v3865_v18  ;;  %v1606_v1 = vpop.f32.mrf.mxu2  ;;  %v1183_v6 = vadd.f32 %v1182_v59, %v3869_v24 }
 0x208   : > { %v1607_v3 = vadd.f32 %v4046_v42, %v1606_v1  ;;  %v1456_v5 = vmul.f32 %v3329_v62, %v1408_v54 }
 0x209   : > { %v1254_v8 = vmul.f32 0.01, %v1054_v0  ;;  %3330 = vtanh.f32 %v1183_v6 }
 0x20a   : > { %v1707_v7 = vmul.f32 0.01, %v1607_v3  ;;  %v1488_v26 = vpack.c.bf16 %v1456_v5, %v1455_v4 }
 0x20b   : > { %v1302_v15 = vmax.f32 %v1054_v0, %v1254_v8 }
 0x20c   : > { %v1755_v11 = vmax.f32 %v1607_v3, %v1707_v7  ;;  %1648 = vmatmul.bf16.gmra.mxu2 %v1488_v26 }
 0x20d   : > { %v1409_v23 = vsub.f32 %v1302_v15, %v3884_v33 }
 0x20e   : > { %v1055_v12 = vpop.f32.mrf.mxu0  ;;  %v1184_v13 = vpop.f32.mrf.mxu1  ;;  %v1796_v14 = vpack.c.bf16 %v1755_v11, %v1754_v9 }
 0x20f   : > { %v1056_v17 = vadd.f32 %v1055_v12, %v3865_v18  ;;  %v1185_v19 = vadd.f32 %v1184_v13, %v3869_v24  ;;  %v1609_v21 = vpop.f32.mrf.mxu2  ;;  %v3331_v29 = vpop.eup %3330 }
 0x210   : > { %2966 = vmatmul.msk.bf16.gmra.mxu3 %vm1850_vm4, %v1796_v14  ;;  %v1610_v30 = vadd.f32 %v4046_v42, %v1609_v21  ;;  %v1457_v39 = vmul.f32 %v3331_v29, %v1409_v23  ;;  %v4144_v29 = vpop.f32.mrf.mxu3 }
 0x211   : > { %v1255_v22 = vmul.f32 0.01, %v1056_v17  ;;  %3332 = vtanh.f32 %v1185_v19 }
 0x212   : > { %v1708_v40 = vmul.f32 0.01, %v1610_v30 }
 0x213   : > { %v1303_v27 = vmax.f32 %v1056_v17, %v1255_v22 }
 0x214   : > { %v1756_v50 = vmax.f32 %v1610_v30, %v1708_v40 }
 0x215   : > { %v1410_v31 = vsub.f32 %v1303_v27, %v3893_v38 }
 0x216   : > { %v1058_v32 = vpop.f32.mrf.mxu0  ;;  %v1187_v34 = vpop.f32.mrf.mxu1 }
 0x217   : > { %v3333_v36 = vpop.eup %3332  ;;  %v1611_v37 = vpop.f32.mrf.mxu2  ;;  %v1059_v41 = vadd.f32 %v1058_v32, %v3865_v18  ;;  %v1188_v49 = vadd.f32 %v1187_v34, %v3869_v24 }
 0x218   : > { %v1612_v44 = vadd.f32 %v4046_v42, %v1611_v37  ;;  %v1458_v45 = vmul.f32 %v3333_v36, %v1410_v31 }
 0x219   : > { %v1256_v52 = vmul.f32 0.01, %v1059_v41  ;;  %3334 = vtanh.f32 %v1188_v49 }
 0x21a   : > { %v1709_v47 = vmul.f32 0.01, %v1612_v44  ;;  %v1489_v48 = vpack.c.bf16 %v1458_v45, %v1457_v39 }
 0x21b   : > { %v1304_v3 = vmax.f32 %v1059_v41, %v1256_v52 }
 0x21c   : > { %v1757_v54 = vmax.f32 %v1612_v44, %v1709_v47  ;;  %1653 = vmatmul.bf16.gmra.mxu2 %v1489_v48 }
 0x21d   : > { %v1411_v6 = vsub.f32 %v1304_v3, %v3909_v56 }
 0x21e   : > { %v1060_v57 = vpop.f32.mrf.mxu0  ;;  %v1189_v59 = vpop.f32.mrf.mxu1  ;;  %v1797_v62 = vpack.c.bf16 %v1757_v54, %v1756_v50 }
 0x21f   : > { %v1061_v0 = vadd.f32 %v1060_v57, %v3865_v18  ;;  %v1190_v1 = vadd.f32 %v1189_v59, %v3869_v24  ;;  %v1614_v2 = vpop.f32.mrf.mxu2  ;;  %v3335_v26 = vpop.eup %3334 }
 0x220   : > { %2967 = vmatmul.msk.bf16.gmra.mxu3 %vm1850_vm4, %v1797_v62  ;;  %v1615_v7 = vadd.f32 %v4046_v42, %v1614_v2  ;;  %v1459_v19 = vmul.f32 %v3335_v26, %v1411_v6 }
 0x221   : > { %v1257_v4 = vmul.f32 0.01, %v1061_v0  ;;  %3336 = vtanh.f32 %v1190_v1 }
 0x222   : > { %v1710_v15 = vmul.f32 0.01, %v1615_v7 }
 0x223   : > { %v1305_v5 = vmax.f32 %v1061_v0, %v1257_v4 }
 0x224   : > { %v1758_v31 = vmax.f32 %v1615_v7, %v1710_v15 }
 0x225   : > { %v1412_v8 = vsub.f32 %v1305_v5, %v3918_v61 }
 0x226   : > { %v1063_v9 = vpop.f32.mrf.mxu0  ;;  %v1192_v11 = vpop.f32.mrf.mxu1 }
 0x227   : > { %v3337_v12 = vpop.eup %3336  ;;  %v1064_v13 = vadd.f32 %v1063_v9, %v3865_v18  ;;  %v1616_v14 = vpop.f32.mrf.mxu2  ;;  %v1193_v22 = vadd.f32 %v1192_v11, %v3869_v24 }
 0x228   : > { %v1617_v17 = vadd.f32 %v4046_v42, %v1616_v14  ;;  %v1460_v21 = vmul.f32 %v3337_v12, %v1412_v8 }
 0x229   : > { %v1258_v30 = vmul.f32 0.01, %v1064_v13  ;;  %3338 = vtanh.f32 %v1193_v22 }
 0x22a   : > { %v1711_v23 = vmul.f32 0.01, %v1617_v17  ;;  %v1490_v27 = vpack.c.bf16 %v1460_v21, %v1459_v19 }
 0x22b   : > { %v1306_v39 = vmax.f32 %v1064_v13, %v1258_v30 }
 0x22c   : > { %v1759_v32 = vmax.f32 %v1617_v17, %v1711_v23  ;;  %1658 = vmatmul.bf16.gmra.mxu2 %v1490_v27 }
 0x22d   : > { %v1413_v47 = vsub.f32 %v1306_v39, %v3936_v16 }
 0x22e   : > { %v1065_v34 = vpop.f32.mrf.mxu0  ;;  %v1194_v36 = vpop.f32.mrf.mxu1  ;;  %v1798_v37 = vpack.c.bf16 %v1759_v32, %v1758_v31 }
 0x22f   : > { %v1066_v40 = vadd.f32 %v1065_v34, %v3865_v18  ;;  %v1195_v41 = vadd.f32 %v1194_v36, %v3869_v24  ;;  %v1619_v44 = vpop.f32.mrf.mxu2  ;;  %v3339_v50 = vpop.eup %3338 }
 0x230   : > { %2968 = vmatmul.msk.bf16.gmra.mxu3 %vm1850_vm4, %v1798_v37  ;;  %v1620_v52 = vadd.f32 %v4046_v42, %v1619_v44  ;;  %v1461_v1 = vmul.f32 %v3339_v50, %v1413_v47 }
 0x231   : > { %v1259_v45 = vmul.f32 0.01, %v1066_v40  ;;  %3340 = vtanh.f32 %v1195_v41 }
 0x232   : > { %v1712_v2 = vmul.f32 0.01, %v1620_v52 }
 0x233   : > { %v1307_v48 = vmax.f32 %v1066_v40, %v1259_v45  ;;  %v4150_v49 = vpop.f32.mrf.mxu3 }
 0x234   : > { %v1760_v9 = vmax.f32 %v1620_v52, %v1712_v2 }
 0x235   : > { %v1414_v54 = vsub.f32 %v1307_v48, %v3947_v25 }
 0x236   : > { %v1068_v57 = vpop.f32.mrf.mxu0  ;;  %v1197_v59 = vpop.f32.mrf.mxu1 }
 0x237   : > { %v3341_v62 = vpop.eup %3340  ;;  %v1621_v0 = vpop.f32.mrf.mxu2  ;;  %v1069_v3 = vadd.f32 %v1068_v57, %v3865_v18  ;;  %v1198_v26 = vadd.f32 %v1197_v59, %v3869_v24 }
 0x238   : > { %v1622_v4 = vadd.f32 %v4046_v42, %v1621_v0  ;;  %v1462_v5 = vmul.f32 %v3341_v62, %v1414_v54 }
 0x239   : > { %v1260_v11 = vmul.f32 0.01, %v1069_v3  ;;  %3342 = vtanh.f32 %v1198_v26 }
 0x23a   : > { %v1713_v6 = vmul.f32 0.01, %v1622_v4  ;;  %v1491_v7 = vpack.c.bf16 %v1462_v5, %v1461_v1 }
 0x23b   : > { %v4157_v8 = vpop.f32.mrf.mxu3  ;;  %v1308_v22 = vmax.f32 %v1069_v3, %v1260_v11 }
 0x23c   : > { %v1761_v12 = vmax.f32 %v1622_v4, %v1713_v6  ;;  %1663 = vmatmul.bf16.gmra.mxu2 %v1491_v7 }
 0x23d   : > { %v1415_v31 = vsub.f32 %v1308_v22, %v3961_v46 }
 0x23e   : > { %v1070_v13 = vpop.f32.mrf.mxu0  ;;  %v1199_v14 = vpop.f32.mrf.mxu1  ;;  %v1799_v15 = vpack.c.bf16 %v1761_v12, %v1760_v9 }
 0x23f   : > { %v1071_v17 = vadd.f32 %v1070_v13, %v3865_v18  ;;  %v1200_v19 = vadd.f32 %v1199_v14, %v3869_v24  ;;  %v1624_v21 = vpop.f32.mrf.mxu2  ;;  %v3343_v34 = vpop.eup %3342 }
 0x240   : > { %2969 = vmatmul.msk.bf16.gmra.mxu3 %vm1850_vm4, %v1799_v15  ;;  %v1625_v32 = vadd.f32 %v4046_v42, %v1624_v21  ;;  %v1463_v48 = vmul.f32 %v3343_v34, %v1415_v31 }
 0x241   : > { %v1261_v23 = vmul.f32 0.01, %v1071_v17  ;;  %3344 = vtanh.f32 %v1200_v19 }
 0x242   : > { %v1714_v45 = vmul.f32 0.01, %v1625_v32 }
 0x243   : > { %v1309_v27 = vmax.f32 %v1071_v17, %v1261_v23  ;;  %v4162_v30 = vpop.f32.mrf.mxu3 }
 0x244   : > { %v1762_v62 = vmax.f32 %v1625_v32, %v1714_v45 }
 0x245   : > { %v1416_v36 = vsub.f32 %v1309_v27, %v3975_v60 }
 0x246   : > { %v1073_v37 = vpop.f32.mrf.mxu0  ;;  %v1202_v39 = vpop.f32.mrf.mxu1 }
 0x247   : > { %v3345_v40 = vpop.eup %3344  ;;  %v1074_v41 = vadd.f32 %v1073_v37, %v3865_v18  ;;  %v1626_v44 = vpop.f32.mrf.mxu2  ;;  %v1203_v52 = vadd.f32 %v1202_v39, %v3869_v24 }
 0x248   : > { %v1627_v47 = vadd.f32 %v4046_v42, %v1626_v44  ;;  %v1464_v50 = vmul.f32 %v3345_v40, %v1416_v36 }
 0x249   : > { %v1262_v57 = vmul.f32 0.01, %v1074_v41  ;;  %3346 = vtanh.f32 %v1203_v52 }
 0x24a   : > { %v1715_v54 = vmul.f32 0.01, %v1627_v47  ;;  %v1492_v46 = vpack.c.bf16 %v1464_v50, %v1463_v48 }
 0x24b   : > { %v4170_v59 = vpop.f32.mrf.mxu3  ;;  %v1310_v4 = vmax.f32 %v1074_v41, %v1262_v57 }
 0x24c   : > { %v1763_v0 = vmax.f32 %v1627_v47, %v1715_v54  ;;  %1668 = vmatmul.bf16.gmra.mxu2 %v1492_v46 }
 0x24d   : > { %v1417_v9 = vsub.f32 %v1310_v4, %v3884_v33 }
 0x24e   : > { %v1800_v1 = vpack.c.bf16 %v1763_v0, %v1762_v62  ;;  %v1075_v2 = vpop.f32.mrf.mxu0  ;;  %v1204_v3 = vpop.f32.mrf.mxu1 }
 0x24f   : > { %v1076_v5 = vadd.f32 %v1075_v2, %v3865_v18  ;;  %v1205_v6 = vadd.f32 %v1204_v3, %v3869_v24  ;;  %v1629_v7 = vpop.f32.mrf.mxu2  ;;  %v3347_v13 = vpop.eup %3346 }
 0x250   : > { %2970 = vmatmul.msk.bf16.gmra.mxu3 %vm1850_vm4, %v1800_v1  ;;  %v1630_v14 = vadd.f32 %v4046_v42, %v1629_v7  ;;  %v1465_v23 = vmul.f32 %v3347_v13, %v1417_v9 }
 0x251   : > { %v1263_v26 = vmul.f32 0.01, %v1076_v5  ;;  %3348 = vtanh.f32 %v1205_v6 }
 0x252   : > { %v1716_v27 = vmul.f32 0.01, %v1630_v14 }
 0x253   : > { %v1311_v11 = vmax.f32 %v1076_v5, %v1263_v26  ;;  %v4176_v12 = vpop.f32.mrf.mxu3 }
 0x254   : > { %v1764_v40 = vmax.f32 %v1630_v14, %v1716_v27 }
 0x255   : > { %v1418_v15 = vsub.f32 %v1311_v11, %v3893_v38  ;;  %v3084_v38 = vld [vmem:[%s4619_s7 + $0x10] sm:$0xff] }
 0x256   : > { %v1078_v17 = vpop.f32.mrf.mxu0  ;;  %v1207_v19 = vpop.f32.mrf.mxu1  ;;  %2301 = vmatpush.bf16.msrb.mxu0 %v3084_v38 }
 0x257   : > { %v3349_v21 = vpop.eup %3348  ;;  %v1631_v22 = vpop.f32.mrf.mxu2  ;;  %v1079_v31 = vadd.f32 %v1078_v17, %v3865_v18  ;;  %v1208_v37 = vadd.f32 %v1207_v19, %v3869_v24 }
 0x258   : > { %v1632_v32 = vadd.f32 %v4046_v42, %v1631_v22  ;;  %v1466_v34 = vmul.f32 %v3349_v21, %v1418_v15 }
 0x259   : > { %v1264_v41 = vmul.f32 0.01, %v1079_v31  ;;  %3350 = vtanh.f32 %v1208_v37 }
 0x25a   : > { %v1717_v33 = vmul.f32 0.01, %v1632_v32  ;;  %v1493_v36 = vpack.c.bf16 %v1466_v34, %v1465_v23 }
 0x25b   : > { %v4183_v39 = vpop.f32.mrf.mxu3  ;;  %v1312_v46 = vmax.f32 %v1079_v31, %v1264_v41 }
 0x25c   : > { %v1765_v44 = vmax.f32 %v1632_v32, %v1717_v33  ;;  %1673 = vmatmul.bf16.gmra.mxu2 %v1493_v36 }
 0x25d   : > { %v1419_v1 = vsub.f32 %v1312_v46, %v3909_v56  ;;  %v4201_v56 = vld [vmem:[%s4618_s6] ss:$0 sm:$0xff] }
 0x25e   : > { %v1801_v45 = vpack.c.bf16 %v1765_v44, %v1764_v40  ;;  %v1080_v47 = vpop.f32.mrf.mxu0  ;;  %v1209_v48 = vpop.f32.mrf.mxu1  ;;  %v1933_v31 = vadd.f32 %v4201_v56, %v4150_v49 }
 0x25f   : > { %v1081_v50 = vadd.f32 %v1080_v47, %v3865_v18  ;;  %v1210_v52 = vadd.f32 %v1209_v48, %v3869_v24  ;;  %v1634_v54 = vpop.f32.mrf.mxu2  ;;  %v3351_v3 = vpop.eup %3350 }
 0x260   : > { %2971 = vmatmul.msk.bf16.gmra.mxu3 %vm1850_vm4, %v1801_v45  ;;  %v1635_v2 = vadd.f32 %v4046_v42, %v1634_v54  ;;  %v1467_v14 = vmul.f32 %v3351_v3, %v1419_v1  ;;  %v2052_v41 = vmul.f32 0.01, %v1933_v31  ;;  %v1091_v54 = vadd.f32 %v3921_v63, %v3865_v18 }
 0x261   : > { %v1265_v57 = vmul.f32 0.01, %v1081_v50  ;;  %3352 = vtanh.f32 %v1210_v52 }
 0x262   : > { %v1718_v11 = vmul.f32 0.01, %v1635_v2  ;;  %v2100_v46 = vmax.f32 %v1933_v31, %v2052_v41 }
 0x263   : > { %v1313_v62 = vmax.f32 %v1081_v50, %v1265_v57  ;;  %v4191_v0 = vpop.f32.mrf.mxu3 }
 0x264   : > { %v1766_v23 = vmax.f32 %v1635_v2, %v1718_v11 }
 0x265   : > { %v1420_v4 = vsub.f32 %v1313_v62, %v3918_v61  ;;  %v1935_v62 = vadd.f32 %v4201_v56, %v4157_v8 }
 0x266   : > { %v1083_v5 = vpop.f32.mrf.mxu0  ;;  %v1212_v6 = vpop.f32.mrf.mxu1 }
 0x267   : > { %v3353_v7 = vpop.eup %3352  ;;  %v1084_v26 = vadd.f32 %v1083_v5, %v3865_v18  ;;  %v1636_v9 = vpop.f32.mrf.mxu2  ;;  %v1213_v17 = vadd.f32 %v1212_v6, %v3869_v24  ;;  %v2053_v63 = vmul.f32 0.01, %v1935_v62 }
 0x268   : > { %v1637_v13 = vadd.f32 %v4046_v42, %v1636_v9  ;;  %v1468_v15 = vmul.f32 %v3353_v7, %v1420_v4  ;;  %v1269_v9 = vmul.f32 0.01, %v1091_v54 }
 0x269   : > { %v1266_v21 = vmul.f32 0.01, %v1084_v26  ;;  %3354 = vtanh.f32 %v1213_v17 }
 0x26a   : > { %v1719_v19 = vmul.f32 0.01, %v1637_v13  ;;  %v1494_v61 = vpack.c.bf16 %v1468_v15, %v1467_v14  ;;  %v1317_v17 = vmax.f32 %v1091_v54, %v1269_v9 }
 0x26b   : > { %v4204_v22 = vpop.f32.mrf.mxu3  ;;  %v1314_v36 = vmax.f32 %v1084_v26, %v1266_v21 }
 0x26c   : > { %v1767_v27 = vmax.f32 %v1637_v13, %v1719_v19  ;;  %1678 = vmatmul.bf16.gmra.mxu2 %v1494_v61  ;;  %v2101_v19 = vmax.f32 %v1935_v62, %v2053_v63  ;;  %v1938_v61 = vadd.f32 %v4201_v56, %v4162_v30 }
 0x26d   : > { %v1421_v45 = vsub.f32 %v1314_v36, %v3936_v16  ;;  %v1220_v16 = vadd.f32 %v4144_v29, %v3869_v24 }
 0x26e   : > { %v1802_v32 = vpack.c.bf16 %v1767_v27, %v1766_v23  ;;  %v1085_v34 = vpop.f32.mrf.mxu0  ;;  %v1214_v33 = vpop.f32.mrf.mxu1  ;;  %v2054_v36 = vmul.f32 0.01, %v1938_v61 }
 0x26f   : > { %v1086_v37 = vadd.f32 %v1085_v34, %v3865_v18  ;;  %v1215_v38 = vadd.f32 %v1214_v33, %v3869_v24  ;;  %v1639_v40 = vpop.f32.mrf.mxu2  ;;  %v3355_v49 = vpop.eup %3354  ;;  %v4223_v18 = vsel %vm1850_vm4, %v2100_v46, -inf  ;;  %v4236_v33 = vsel %vm1850_vm4, %v2101_v19, -inf }
 0x270   : > { %2972 = vmatmul.msk.bf16.gmra.mxu3 %vm1850_vm4, %v1802_v32  ;;  %v1640_v50 = vadd.f32 %v4046_v42, %v1639_v40  ;;  %v1469_v4 = vmul.f32 %v3355_v49, %v1421_v45  ;;  %v1424_v32 = vsub.f32 %v1317_v17, %v3975_v60  ;;  %v2102_v45 = vmax.f32 %v1938_v61, %v2054_v36 }
 0x271   : > { %v1267_v44 = vmul.f32 0.01, %v1086_v37  ;;  %3356 = vtanh.f32 %v1215_v38  ;;  %v1940_v60 = vadd.f32 %v4201_v56, %v4170_v59  ;;  %v1945_v19 = vadd.f32 %v4201_v56, %v4183_v39 }
 0x272   : > { %v1720_v5 = vmul.f32 0.01, %v1640_v50  ;;  %3358 = vtanh.f32 %v1220_v16  ;;  %v4250_v46 = vsel %vm1850_vm4, %v2102_v45, -inf }
 0x273   : > { %v1315_v47 = vmax.f32 %v1086_v37, %v1267_v44  ;;  %v1952_v48 = vpop.f32.mrf.mxu3 }
 0x274   : > { %v1953_v52 = vadd.f32 %v4201_v56, %v1952_v48  ;;  %v1768_v13 = vmax.f32 %v1640_v50, %v1720_v5 }
 0x275   : > { %v1422_v57 = vsub.f32 %v1315_v47, %v3947_v25 }
 0x276   : > { %v2060_v1 = vmul.f32 0.01, %v1953_v52 }
 0x277   : > { %v3357_v2 = vpop.eup %3356  ;;  %v1641_v3 = vpop.f32.mrf.mxu2 }
 0x278   : > { %v2108_v6 = vmax.f32 %v1953_v52, %v2060_v1  ;;  %v1642_v7 = vadd.f32 %v4046_v42, %v1641_v3  ;;  %v1470_v26 = vmul.f32 %v3357_v2, %v1422_v57  ;;  %v3359_v34 = vpop.eup %3358  ;;  %v2055_v57 = vmul.f32 0.01, %v1940_v60 }
 0x279   : > { %v1472_v44 = vmul.f32 %v3359_v34, %v1424_v32  ;;  %v2057_v34 = vmul.f32 0.01, %v1945_v19 }
 0x27a   : > { %v4226_v25 = vsel %vm1850_vm4, %v2108_v6, -inf  ;;  %v1721_v8 = vmul.f32 0.01, %v1642_v7  ;;  %v1495_v11 = vpack.c.bf16 %v1470_v26, %v1469_v4 }
 0x27b   : > { %v2150_v24 = vmax.f32 %v4223_v18, %v4226_v25  ;;  %v1954_v29 = vpop.f32.mrf.mxu3  ;;  %v1496_v54 = vpack.c.bf16 %v1472_v44, %v3966_v53  ;;  %v1943_v53 = vadd.f32 %v4201_v56, %v4176_v12 }
 0x27c   : > { %v1769_v14 = vmax.f32 %v1642_v7, %v1721_v8  ;;  %v1955_v15 = vadd.f32 %v4201_v56, %v1954_v29  ;;  %1683 = vmatmul.bf16.gmra.mxu2 %v1495_v11  ;;  %v3089_v7 = vld [vmem:[%s4621_s9 + $0x18] sm:$0xff] }
 0x27d   : > { %2393 = vmatpush.bf16.msrb.mxu1 %v3089_v7  ;;  %v2056_v8 = vmul.f32 0.01, %v1943_v53 }
 0x27e   : > { %v1803_v21 = vpack.c.bf16 %v1769_v14, %v1768_v13  ;;  %v2061_v23 = vmul.f32 0.01, %v1955_v15  ;;  %v4275_v13 = vld [vmem:[%s4616_s4] ss:$0 sm:$0xff] }
 0x27f   : > { %v1644_v27 = vpop.f32.mrf.mxu2  ;;  %v2104_v17 = vmax.f32 %v1943_v53, %v2056_v8 }
 0x280   : > { %v2109_v31 = vmax.f32 %v1955_v15, %v2061_v23  ;;  %2973 = vmatmul.msk.bf16.gmra.mxu3 %vm1850_vm4, %v1803_v21  ;;  %v1645_v40 = vadd.f32 %v4046_v42, %v1644_v27 }
 0x281   : > { %v4283_v32 = vsel %vm1850_vm4, %v2104_v17, -inf }
 0x282   : > { %v4239_v37 = vsel %vm1850_vm4, %v2109_v31, -inf  ;;  %v1722_v49 = vmul.f32 0.01, %v1645_v40 }
 0x283   : > { %v2161_v38 = vmax.f32 %v4236_v33, %v4239_v37  ;;  %v1957_v30 = vpop.f32.mrf.mxu3 }
 0x284   : > { %v1958_v41 = vadd.f32 %v4201_v56, %v1957_v30  ;;  %v1770_v16 = vmax.f32 %v1645_v40, %v1722_v49 }
 0x286   : > { %v2062_v47 = vmul.f32 0.01, %v1958_v41 }
 0x287   : > { %v1646_v48 = vpop.f32.mrf.mxu2 }
 0x288   : > { %v2110_v50 = vmax.f32 %v1958_v41, %v2062_v47  ;;  %v1647_v52 = vadd.f32 %v4046_v42, %v1646_v48  ;;  %v2103_v42 = vmax.f32 %v1940_v60, %v2055_v57  ;;  %v2105_v60 = vmax.f32 %v1945_v19, %v2057_v34 }
 0x289   : > { %v1948_v47 = vadd.f32 %v4201_v56, %v4191_v0 }
 0x28a   : > { %v4253_v62 = vsel %vm1850_vm4, %v2110_v50, -inf  ;;  %v1723_v1 = vmul.f32 0.01, %v1647_v52  ;;  %v4265_v63 = vsel %vm1850_vm4, %v2103_v42, -inf  ;;  %v1950_v42 = vadd.f32 %v4201_v56, %v4204_v22 }
 0x28b   : > { %v2172_v2 = vmax.f32 %v4250_v46, %v4253_v62  ;;  %v1959_v59 = vpop.f32.mrf.mxu3  ;;  %v2058_v57 = vmul.f32 0.01, %v1948_v47 }
 0x28c   : > { %v1771_v3 = vmax.f32 %v1647_v52, %v1723_v1  ;;  %v1960_v4 = vadd.f32 %v4201_v56, %v1959_v59  ;;  %1688 = vmatmul.bf16.gmra.mxu2 %v1496_v54  ;;  %v4295_v54 = vsel %vm1850_vm4, %v2105_v60, -inf  ;;  %v2059_v8 = vmul.f32 0.01, %v1950_v42 }
 0x28e   : > { %v1804_v5 = vpack.c.bf16 %v1771_v3, %v1770_v16  ;;  %v2063_v6 = vmul.f32 0.01, %v1960_v4 }
 0x28f   : > { %v1649_v26 = vpop.f32.mrf.mxu2 }
 0x290   : > { %v2111_v9 = vmax.f32 %v1960_v4, %v2063_v6  ;;  %2974 = vmatmul.msk.bf16.gmra.mxu3 %vm1850_vm4, %v1804_v5  ;;  %v1650_v14 = vadd.f32 %v4275_v13, %v1649_v26  ;;  %v2106_v4 = vmax.f32 %v1948_v47, %v2058_v57  ;;  %v3083_v47 = vld [vmem:[%s4619_s7 + $0x8] sm:$0xff] }
 0x291   : > { %2302 = vmatpush.bf16.msrb.mxu0 %v3083_v47 }
 0x292   : > { %v4268_v11 = vsel %vm1850_vm4, %v2111_v9, -inf  ;;  %v1724_v23 = vmul.f32 0.01, %v1650_v14  ;;  %v4308_v9 = vsel %vm1850_vm4, %v2106_v4, -inf }
 0x293   : > { %v2183_v12 = vmax.f32 %v4265_v63, %v4268_v11  ;;  %v1962_v29 = vpop.f32.mrf.mxu3 }
 0x294   : > { %v1963_v15 = vadd.f32 %v4201_v56, %v1962_v29  ;;  %v1772_v44 = vmax.f32 %v1650_v14, %v1724_v23 }
 0x296   : > { %v2064_v61 = vmul.f32 0.01, %v1963_v15 }
 0x297   : > { %v1651_v21 = vpop.f32.mrf.mxu2 }
 0x298   : > { %v2112_v27 = vmax.f32 %v1963_v15, %v2064_v61  ;;  %v1652_v31 = vadd.f32 %v4275_v13, %v1651_v21  ;;  %v2107_v21 = vmax.f32 %v1950_v42, %v2059_v8 }
 0x29a   : > { %v4286_v36 = vsel %vm1850_vm4, %v2112_v27, -inf  ;;  %v1725_v30 = vmul.f32 0.01, %v1652_v31 }
 0x29b   : > { %v2194_v40 = vmax.f32 %v4283_v32, %v4286_v36  ;;  %v1964_v41 = vpop.f32.mrf.mxu3 }
 0x29c   : > { %v1773_v39 = vmax.f32 %v1652_v31, %v1725_v30  ;;  %v1965_v45 = vadd.f32 %v4201_v56, %v1964_v41  ;;  %v4318_v30 = vsel %vm1850_vm4, %v2107_v21, -inf }
 0x29e   : > { %v1805_v48 = vpack.c.bf16 %v1773_v39, %v1772_v44  ;;  %v2065_v49 = vmul.f32 0.01, %v1965_v45 }
 0x29f   : > { %v1654_v50 = vpop.f32.mrf.mxu2 }
 0x2a0   : > { %v2113_v52 = vmax.f32 %v1965_v45, %v2065_v49  ;;  %2975 = vmatmul.msk.bf16.gmra.mxu3 %vm1850_vm4, %v1805_v48  ;;  %v1655_v3 = vadd.f32 %v4275_v13, %v1654_v50 }
 0x2a2   : > { %v4298_v1 = vsel %vm1850_vm4, %v2113_v52, -inf  ;;  %v1726_v6 = vmul.f32 0.01, %v1655_v3 }
 0x2a3   : > { %v2205_v59 = vmax.f32 %v4295_v54, %v4298_v1  ;;  %v1967_v16 = vpop.f32.mrf.mxu3 }
 0x2a4   : > { %v1968_v0 = vadd.f32 %v4201_v56, %v1967_v16  ;;  %v1774_v19 = vmax.f32 %v1655_v3, %v1726_v6 }
 0x2a6   : > { %v2066_v53 = vmul.f32 0.01, %v1968_v0 }
 0x2a7   : > { %v1656_v5 = vpop.f32.mrf.mxu2 }
 0x2a8   : > { %v2114_v7 = vmax.f32 %v1968_v0, %v2066_v53  ;;  %v1657_v26 = vadd.f32 %v4275_v13, %v1656_v5 }
 0x2aa   : > { %v4311_v29 = vsel %vm1850_vm4, %v2114_v7, -inf  ;;  %v1727_v14 = vmul.f32 0.01, %v1657_v26 }
 0x2ab   : > { %v2216_v15 = vmax.f32 %v4308_v9, %v4311_v29  ;;  %v1969_v17 = vpop.f32.mrf.mxu3 }
 0x2ac   : > { %v1775_v22 = vmax.f32 %v1657_v26, %v1727_v14  ;;  %v1970_v61 = vadd.f32 %v4201_v56, %v1969_v17 }
 0x2ae   : > { %v1806_v23 = vpack.c.bf16 %v1775_v22, %v1774_v19  ;;  %v2067_v27 = vmul.f32 0.01, %v1970_v61 }
 0x2af   : > { %v1659_v31 = vpop.f32.mrf.mxu2 }
 0x2b0   : > { %v2115_v34 = vmax.f32 %v1970_v61, %v2067_v27  ;;  %2976 = vmatmul.msk.bf16.gmra.mxu3 %vm1850_vm4, %v1806_v23  ;;  %v1660_v45 = vadd.f32 %v4275_v13, %v1659_v31 }
 0x2b2   : > { %v4321_v41 = vsel %vm1850_vm4, %v2115_v34, -inf  ;;  %v1728_v50 = vmul.f32 0.01, %v1660_v45 }
 0x2b3   : > { %v2227_v44 = vmax.f32 %v4318_v30, %v4321_v41  ;;  %v1972_v39 = vpop.f32.mrf.mxu3 }
 0x2b4   : > { %v1973_v60 = vadd.f32 %v4201_v56, %v1972_v39  ;;  %v1776_v42 = vmax.f32 %v1660_v45, %v1728_v50 }
 0x2b6   : > { %v2068_v48 = vmul.f32 0.01, %v1973_v60 }
 0x2b7   : > { %v1661_v49 = vpop.f32.mrf.mxu2 }
 0x2b8   : > { %v2116_v52 = vmax.f32 %v1973_v60, %v2068_v48  ;;  %v1662_v57 = vadd.f32 %v4275_v13, %v1661_v49 }
 0x2ba   : > { %v2151_v16 = vsel %vm1850_vm4, %v2116_v52, -inf  ;;  %v1729_v3 = vmul.f32 0.01, %v1662_v57 }
 0x2bb   : > { %v4335_v0 = vmax.f32 %v2150_v24, %v2151_v16  ;;  %v1974_v4 = vpop.f32.mrf.mxu3 }
 0x2bc   : > { %v1777_v53 = vmax.f32 %v1662_v57, %v1729_v3  ;;  %v1975_v5 = vadd.f32 %v4201_v56, %v1974_v4 }
 0x2be   : > { %v1807_v6 = vpack.c.bf16 %v1777_v53, %v1776_v42  ;;  %v2069_v7 = vmul.f32 0.01, %v1975_v5 }
 0x2bf   : > { %v1664_v26 = vpop.f32.mrf.mxu2 }
 0x2c0   : > { %v2117_v8 = vmax.f32 %v1975_v5, %v2069_v7  ;;  %2977 = vmatmul.msk.bf16.gmra.mxu3 %vm1850_vm4, %v1807_v6  ;;  %v1665_v25 = vadd.f32 %v4275_v13, %v1664_v26 }
 0x2c2   : > { %v2162_v14 = vsel %vm1850_vm4, %v2117_v8, -inf  ;;  %v1730_v61 = vmul.f32 0.01, %v1665_v25 }
 0x2c3   : > { %v4343_v17 = vmax.f32 %v2161_v38, %v2162_v14  ;;  %v1977_v18 = vpop.f32.mrf.mxu3 }
 0x2c4   : > { %v1978_v24 = vadd.f32 %v4201_v56, %v1977_v18  ;;  %v1778_v38 = vmax.f32 %v1665_v25, %v1730_v61 }
 0x2c6   : > { %v2070_v19 = vmul.f32 0.01, %v1978_v24 }
 0x2c7   : > { %v1666_v22 = vpop.f32.mrf.mxu2 }
 0x2c8   : > { %v2118_v21 = vmax.f32 %v1978_v24, %v2070_v19  ;;  %v1667_v23 = vadd.f32 %v4275_v13, %v1666_v22 }
 0x2ca   : > { %v2173_v27 = vsel %vm1850_vm4, %v2118_v21, -inf  ;;  %v1731_v31 = vmul.f32 0.01, %v1667_v23 }
 0x2cb   : > { %v4352_v33 = vmax.f32 %v2172_v2, %v2173_v27  ;;  %v1979_v37 = vpop.f32.mrf.mxu3 }
 0x2cc   : > { %v1779_v34 = vmax.f32 %v1667_v23, %v1731_v31  ;;  %v1980_v39 = vadd.f32 %v4201_v56, %v1979_v37 }
 0x2ce   : > { %v1808_v45 = vpack.c.bf16 %v1779_v34, %v1778_v38  ;;  %v2071_v60 = vmul.f32 0.01, %v1980_v39 }
 0x2cf   : > { %v1669_v47 = vpop.f32.mrf.mxu2 }
 0x2d0   : > { %v2119_v48 = vmax.f32 %v1980_v39, %v2071_v60  ;;  %2978 = vmatmul.msk.bf16.gmra.mxu3 %vm1850_vm4, %v1808_v45  ;;  %v1670_v62 = vadd.f32 %v4275_v13, %v1669_v47 }
 0x2d2   : > { %v2184_v49 = vsel %vm1850_vm4, %v2119_v48, -inf  ;;  %v1732_v16 = vmul.f32 0.01, %v1670_v62 }
 0x2d3   : > { %v4360_v50 = vmax.f32 %v2183_v12, %v2184_v49  ;;  %v1982_v46 = vpop.f32.mrf.mxu3 }
 0x2d4   : > { %v1983_v2 = vadd.f32 %v4201_v56, %v1982_v46  ;;  %v1780_v12 = vmax.f32 %v1670_v62, %v1732_v16 }
 0x2d6   : > { %v2072_v52 = vmul.f32 0.01, %v1983_v2 }
 0x2d7   : > { %v1671_v57 = vpop.f32.mrf.mxu2 }
 0x2d8   : > { %v2120_v3 = vmax.f32 %v1983_v2, %v2072_v52  ;;  %v1672_v4 = vadd.f32 %v4275_v13, %v1671_v57 }
 0x2da   : > { %v2195_v42 = vsel %vm1850_vm4, %v2120_v3, -inf  ;;  %v1733_v53 = vmul.f32 0.01, %v1672_v4 }
 0x2db   : > { %v4369_v63 = vmax.f32 %v2194_v40, %v2195_v42  ;;  %v1984_v11 = vpop.f32.mrf.mxu3 }
 0x2dc   : > { %v1781_v5 = vmax.f32 %v1672_v4, %v1733_v53  ;;  %v1985_v6 = vadd.f32 %v4201_v56, %v1984_v11 }
 0x2de   : > { %v1809_v7 = vpack.c.bf16 %v1781_v5, %v1780_v12  ;;  %v2073_v26 = vmul.f32 0.01, %v1985_v6 }
 0x2df   : > { %v1674_v8 = vpop.f32.mrf.mxu2 }
 0x2e0   : > { %v2121_v14 = vmax.f32 %v1985_v6, %v2073_v26  ;;  %2979 = vmatmul.msk.bf16.gmra.mxu3 %vm1850_vm4, %v1809_v7  ;;  %v1675_v36 = vadd.f32 %v4275_v13, %v1674_v8 }
 0x2e2   : > { %v2206_v18 = vsel %vm1850_vm4, %v2121_v14, -inf  ;;  %v1734_v22 = vmul.f32 0.01, %v1675_v36 }
 0x2e3   : > { %v4377_v25 = vmax.f32 %v2205_v59, %v2206_v18  ;;  %v1987_v32 = vpop.f32.mrf.mxu3  ;;  %v3088_v59 = vld [vmem:[%s4621_s9 + $0x10] sm:$0xff] }
 0x2e4   : > { %v1988_v40 = vadd.f32 %v4201_v56, %v1987_v32  ;;  %v1782_v31 = vmax.f32 %v1675_v36, %v1734_v22  ;;  %2394 = vmatpush.bf16.msrb.mxu1 %v3088_v59 }
 0x2e6   : > { %v2074_v24 = vmul.f32 0.01, %v1988_v40 }
 0x2e7   : > { %v1676_v19 = vpop.f32.mrf.mxu2 }
 0x2e8   : > { %v2122_v61 = vmax.f32 %v1988_v40, %v2074_v24  ;;  %v1677_v21 = vadd.f32 %v4275_v13, %v1676_v19 }
 0x2ea   : > { %v2217_v23 = vsel %vm1850_vm4, %v2122_v61, -inf  ;;  %v1735_v27 = vmul.f32 0.01, %v1677_v21 }
 0x2eb   : > { %v4386_v54 = vmax.f32 %v2216_v15, %v2217_v23  ;;  %v1989_v1 = vpop.f32.mrf.mxu3 }
 0x2ec   : > { %v1783_v37 = vmax.f32 %v1677_v21, %v1735_v27  ;;  %v1990_v38 = vadd.f32 %v4201_v56, %v1989_v1 }
 0x2ee   : > { %v1810_v34 = vpack.c.bf16 %v1783_v37, %v1782_v31  ;;  %v2075_v39 = vmul.f32 0.01, %v1990_v38 }
 0x2ef   : > { %v1679_v45 = vpop.f32.mrf.mxu2 }
 0x2f0   : > { %v2123_v60 = vmax.f32 %v1990_v38, %v2075_v39  ;;  %2980 = vmatmul.msk.bf16.gmra.mxu3 %vm1850_vm4, %v1810_v34  ;;  %v1680_v47 = vadd.f32 %v4275_v13, %v1679_v45 }
 0x2f2   : > { %v2228_v9 = vsel %vm1850_vm4, %v2123_v60, -inf  ;;  %v1736_v62 = vmul.f32 0.01, %v1680_v47 }
 0x2f3   : > { %v4397_v29 = vmax.f32 %v2227_v44, %v2228_v9  ;;  %v1992_v15 = vpop.f32.mrf.mxu3 }
 0x2f4   : > { %v1993_v48 = vadd.f32 %v4201_v56, %v1992_v15  ;;  %v1784_v44 = vmax.f32 %v1680_v47, %v1736_v62 }
 0x2f6   : > { %v2076_v49 = vmul.f32 0.01, %v1993_v48 }
 0x2f7   : > { %v1681_v46 = vpop.f32.mrf.mxu2 }
 0x2f8   : > { %v2124_v2 = vmax.f32 %v1993_v48, %v2076_v49  ;;  %v1682_v52 = vadd.f32 %v4275_v13, %v1681_v46 }
 0x2fa   : > { %v4403_v57 = vsel %vm1850_vm4, %v2124_v2, -inf  ;;  %v1737_v16 = vmul.f32 0.01, %v1682_v52 }
 0x2fb   : > { %v2154_v30 = vmax.f32 %v4335_v0, %v4403_v57  ;;  %v1994_v41 = vpop.f32.mrf.mxu3 }
 0x2fc   : > { %v1785_v3 = vmax.f32 %v1682_v52, %v1737_v16  ;;  %v1995_v4 = vadd.f32 %v4201_v56, %v1994_v41 }
 0x2fe   : > { %v1811_v42 = vpack.c.bf16 %v1785_v3, %v1784_v44  ;;  %v2077_v53 = vmul.f32 0.01, %v1995_v4 }
 0x2ff   : > { %v1684_v11 = vpop.f32.mrf.mxu2 }
 0x300   : > { %v2125_v12 = vmax.f32 %v1995_v4, %v2077_v53  ;;  %2981 = vmatmul.msk.bf16.gmra.mxu3 %vm1850_vm4, %v1811_v42  ;;  %v1685_v26 = vadd.f32 %v4275_v13, %v1684_v11 }
 0x302   : > { %v4410_v5 = vsel %vm1850_vm4, %v2125_v12, -inf  ;;  %v1738_v32 = vmul.f32 0.01, %v1685_v26 }
 0x303   : > { %v2165_v6 = vmax.f32 %v4343_v17, %v4410_v5  ;;  %v1997_v7 = vpop.f32.mrf.mxu3 }
 0x304   : > { %v1998_v8 = vadd.f32 %v4201_v56, %v1997_v7  ;;  %v1786_v21 = vmax.f32 %v1685_v26, %v1738_v32 }
 0x306   : > { %v2078_v14 = vmul.f32 0.01, %v1998_v8 }
 0x307   : > { %v1686_v18 = vpop.f32.mrf.mxu2 }
 0x308   : > { %v2126_v36 = vmax.f32 %v1998_v8, %v2078_v14  ;;  %v1687_v40 = vadd.f32 %v4275_v13, %v1686_v18 }
 0x30a   : > { %v4418_v24 = vsel %vm1850_vm4, %v2126_v36, -inf  ;;  %v1739_v19 = vmul.f32 0.01, %v1687_v40 }
 0x30b   : > { %v2176_v22 = vmax.f32 %v4352_v33, %v4418_v24  ;;  %v1999_v61 = vpop.f32.mrf.mxu3  ;;  %v3082_v33 = vld [vmem:[%s4619_s7] sm:$0xff] }
 0x30c   : > { %v1787_v23 = vmax.f32 %v1687_v40, %v1739_v19  ;;  %v2000_v27 = vadd.f32 %v4201_v56, %v1999_v61  ;;  %2303 = vmatpush.bf16.msrb.mxu0 %v3082_v33 }
 0x30e   : > { %v1812_v1 = vpack.c.bf16 %v1787_v23, %v1786_v21  ;;  %v2079_v59 = vmul.f32 0.01, %v2000_v27 }
 0x30f   : > { %v1689_v31 = vpop.f32.mrf.mxu2 }
 0x310   : > { %v2127_v37 = vmax.f32 %v2000_v27, %v2079_v59  ;;  %2982 = vmatmul.msk.bf16.gmra.mxu3 %vm1850_vm4, %v1812_v1  ;;  %v1690_v45 = vadd.f32 %v4275_v13, %v1689_v31  ;;  %v3087_v31 = vld [vmem:[%s4621_s9 + $0x8] sm:$0xff] }
 0x311   : > { %2395 = vmatpush.bf16.msrb.mxu1 %v3087_v31 }
 0x312   : > { %v4425_v38 = vsel %vm1850_vm4, %v2127_v37, -inf  ;;  %v1740_v47 = vmul.f32 0.01, %v1690_v45 }
 0x313   : > { %v2187_v34 = vmax.f32 %v4360_v50, %v4425_v38  ;;  %v2002_v39 = vpop.f32.mrf.mxu3  ;;  %v3086_v50 = vld [vmem:[%s4621_s9] sm:$0xff] }
 0x314   : > { %v2003_v60 = vadd.f32 %v4201_v56, %v2002_v39  ;;  %v1788_v16 = vmax.f32 %v1690_v45, %v1740_v47 }
 0x315   : > { %2396 = vmatpush.bf16.msrb.mxu1 %v3086_v50 }
 0x316   : > { %v2080_v9 = vmul.f32 0.01, %v2003_v60 }
 0x317   : > { %v1691_v15 = vpop.f32.mrf.mxu2 }
 0x318   : > { %v2128_v48 = vmax.f32 %v2003_v60, %v2080_v9  ;;  %v1692_v49 = vadd.f32 %v4275_v13, %v1691_v15 }
 0x31a   : > { %v2197_v46 = vsel %vm1850_vm4, %v2128_v48, -inf  ;;  %v1741_v62 = vmul.f32 0.01, %v1692_v49 }
 0x31b   : > { %v2198_v2 = vmax.f32 %v4369_v63, %v2197_v46  ;;  %v2004_v52 = vpop.f32.mrf.mxu3 }
 0x31c   : > { %v1789_v41 = vmax.f32 %v1692_v49, %v1741_v62  ;;  %v2005_v44 = vadd.f32 %v4201_v56, %v2004_v52 }
 0x31e   : > { %v1813_v3 = vpack.c.bf16 %v1789_v41, %v1788_v16  ;;  %v2081_v4 = vmul.f32 0.01, %v2005_v44 }
 0x320   : > { %v2129_v42 = vmax.f32 %v2005_v44, %v2081_v4  ;;  %2983 = vmatmul.msk.bf16.gmra.mxu3 %vm1850_vm4, %v1813_v3 }
 0x322   : > { %v4440_v53 = vsel %vm1850_vm4, %v2129_v42, -inf }
 0x323   : > { %v2209_v13 = vmax.f32 %v4377_v25, %v4440_v53  ;;  %v2007_v11 = vpop.f32.mrf.mxu3 }
 0x324   : > { %v2008_v12 = vadd.f32 %v4201_v56, %v2007_v11 }
 0x326   : > { %v2082_v63 = vmul.f32 0.01, %v2008_v12 }
 0x328   : > { %v2130_v7 = vmax.f32 %v2008_v12, %v2082_v63 }
 0x32a   : > { %v2219_v26 = vsel %vm1850_vm4, %v2130_v7, -inf }
 0x32b   : > { %v2220_v8 = vmax.f32 %v4386_v54, %v2219_v26  ;;  %v2009_v14 = vpop.f32.mrf.mxu3 }
 0x32c   : > { %v2010_v18 = vadd.f32 %v4201_v56, %v2009_v14 }
 0x32e   : > { %v2083_v32 = vmul.f32 0.01, %v2010_v18 }
 0x330   : > { %v2131_v36 = vmax.f32 %v2010_v18, %v2083_v32 }
 0x332   : > { %v4449_v40 = vsel %vm1850_vm4, %v2131_v36, -inf }
 0x333   : > { %v2231_v24 = vmax.f32 %v4397_v29, %v4449_v40  ;;  %v2012_v19 = vpop.f32.mrf.mxu3 }
 0x334   : > { %v2013_v61 = vadd.f32 %v4201_v56, %v2012_v19 }
 0x336   : > { %v2084_v21 = vmul.f32 0.01, %v2013_v61 }
 0x338   : > { %v2132_v23 = vmax.f32 %v2013_v61, %v2084_v21 }
 0x33a   : > { %v2155_v27 = vsel %vm1850_vm4, %v2132_v23, -inf }
 0x33b   : > { %v2156_v54 = vmax.f32 %v2154_v30, %v2155_v27  ;;  %v2014_v1 = vpop.f32.mrf.mxu3 }
 0x33c   : > { %v2015_v3 = vadd.f32 %v4201_v56, %v2014_v1 }
 0x33e   : > { %v2085_v11 = vmul.f32 0.01, %v2015_v3 }
 0x343   : > { %v2017_v59 = vpop.f32.mrf.mxu3 }
 0x344   : > { %v2018_v37 = vadd.f32 %v4201_v56, %v2017_v59 }
 0x346   : > { %v2086_v39 = vmul.f32 0.01, %v2018_v37 }
 0x348   : > { %v2134_v33 = vmax.f32 %v2018_v37, %v2086_v39 }
 0x34a   : > { %v2177_v45 = vsel %vm1850_vm4, %v2134_v33, -inf }
 0x34b   : > { %v2178_v60 = vmax.f32 %v2176_v22, %v2177_v45  ;;  %v2019_v9 = vpop.f32.mrf.mxu3 }
 0x34c   : > { %v2020_v61 = vadd.f32 %v4201_v56, %v2019_v9 }
 0x34e   : > { %v2087_v37 = vmul.f32 0.01, %v2020_v61 }
 0x350   : > { %v2135_v17 = vmax.f32 %v2020_v61, %v2087_v37 }
 0x352   : > { %v2188_v45 = vsel %vm1850_vm4, %v2135_v17, -inf }
 0x353   : > { %v2022_v15 = vpop.f32.mrf.mxu3 }
 0x354   : > { %v2023_v47 = vadd.f32 %v4201_v56, %v2022_v15 }
 0x356   : > { %v2088_v0 = vmul.f32 0.01, %v2023_v47 }
 0x358   : > { %v2136_v57 = vmax.f32 %v2023_v47, %v2088_v0 }
 0x35a   : > { %v2199_v30 = vsel %vm1850_vm4, %v2136_v57, -inf }
 0x35b   : > { %v4465_v48 = vmax.f32 %v2198_v2, %v2199_v30  ;;  %v2024_v49 = vpop.f32.mrf.mxu3  ;;  %v2133_v2 = vmax.f32 %v2015_v3, %v2085_v11 }
 0x35c   : > { %v2025_v0 = vadd.f32 %v4201_v56, %v2024_v49 }
 0x35d   : > { %v2166_v14 = vsel %vm1850_vm4, %v2133_v2, -inf }
 0x35e   : > { %v2167_v36 = vmax.f32 %v2165_v6, %v2166_v14 }
 0x363   : > { %v2027_v46 = vpop.f32.mrf.mxu3 }
 0x364   : > { %v2028_v62 = vadd.f32 %v4201_v56, %v2027_v46 }
 0x366   : > { %v2090_v52 = vmul.f32 0.01, %v2028_v62 }
 0x368   : > { %v2138_v16 = vmax.f32 %v2028_v62, %v2090_v52 }
 0x36a   : > { %v2221_v41 = vsel %vm1850_vm4, %v2138_v16, -inf }
 0x36b   : > { %v4469_v44 = vmax.f32 %v2220_v8, %v2221_v41  ;;  %v2029_v22 = vpop.f32.mrf.mxu3  ;;  %v2089_v41 = vmul.f32 0.01, %v2025_v0 }
 0x36d   : > { %v2137_v38 = vmax.f32 %v2025_v0, %v2089_v41 }
 0x373   : > { %v2032_v4 = vpop.f32.mrf.mxu3 }
 0x374   : > { %v2033_v42 = vadd.f32 %v4201_v56, %v2032_v4 }
 0x376   : > { %v2092_v12 = vmul.f32 0.01, %v2033_v42 }
 0x378   : > { %v2140_v63 = vmax.f32 %v2033_v42, %v2092_v12  ;;  %v2210_v42 = vsel %vm1850_vm4, %v2137_v38, -inf }
 0x379   : > { %v2211_v12 = vmax.f32 %v2209_v13, %v2210_v42 }
 0x37a   : > { %v2157_v18 = vsel %vm1850_vm4, %v2140_v63, -inf  ;;  %v2030_v63 = vadd.f32 %v4201_v56, %v2029_v22 }
 0x37b   : > { %v2034_v7 = vpop.f32.mrf.mxu3  ;;  %v2158_v19 = vmax.f32 %v2156_v54, %v2157_v18 }
 0x37c   : > { %v2035_v26 = vadd.f32 %v4201_v56, %v2034_v7 }
 0x37d   : > { %v2236_v59 = vadd.f32 %v2158_v19, %v3876_v28  ;;  %v2189_v28 = vmax.f32 %v2187_v34, %v2188_v45 }
 0x37e   : > { %v2093_v32 = vmul.f32 0.01, %v2035_v26 }
 0x380   : > { %v2141_v8 = vmax.f32 %v2035_v26, %v2093_v32 }
 0x382   : > { %v2168_v21 = vsel %vm1850_vm4, %v2141_v8, -inf }
 0x383   : > { %v2169_v23 = vmax.f32 %v2167_v36, %v2168_v21  ;;  %v2037_v27 = vpop.f32.mrf.mxu3  ;;  %v2091_v36 = vmul.f32 0.01, %v2030_v63 }
 0x384   : > { %v2038_v1 = vadd.f32 %v4201_v56, %v2037_v27 }
 0x385   : > { %v2237_v31 = vadd.f32 %v2169_v23, %v3886_v35  ;;  %v2139_v25 = vmax.f32 %v2030_v63, %v2091_v36 }
 0x386   : > { %v2094_v39 = vmul.f32 0.01, %v2038_v1 }
 0x387   : > { %v2244_v33 = vpack.c.bf16 %v2237_v31, %v2236_v59  ;;  %v2232_v22 = vsel %vm1850_vm4, %v2139_v25, -inf }
 0x388   : > { %v2142_v5 = vmax.f32 %v2038_v1, %v2094_v39 }
 0x389   : > { %3000 = vmatmul.msk.bf16.vlgmr.msrb.gmra.mxu0 %vm1850_vm4, %v2244_v33  ;;  %v3263_v33 = vld [vmem:[%s4620_s8] ss:$0 sm:$0xff] }
 0x38a   : > { %v2179_v9 = vsel %vm1850_vm4, %v2142_v5, -inf }
 0x38b   : > { %v2039_v6 = vpop.f32.mrf.mxu3  ;;  %v2180_v35 = vmax.f32 %v2178_v60, %v2179_v9 }
 0x38c   : > { %v2040_v54 = vadd.f32 %v4201_v56, %v2039_v6 }
 0x38d   : > { %v2238_v52 = vadd.f32 %v2180_v35, %v3902_v51 }
 0x38e   : > { %v2095_v15 = vmul.f32 0.01, %v2040_v54 }
 0x390   : > { %v2143_v47 = vmax.f32 %v2040_v54, %v2095_v15 }
 0x392   : > { %v2190_v57 = vsel %vm1850_vm4, %v2143_v47, -inf }
 0x393   : > { %v2191_v30 = vmax.f32 %v2189_v28, %v2190_v57  ;;  %v2042_v46 = vpop.f32.mrf.mxu3 }
 0x394   : > { %v2043_v62 = vadd.f32 %v4201_v56, %v2042_v46 }
 0x395   : > { %v2239_v16 = vadd.f32 %v2191_v30, %v3911_v58 }
 0x396   : > { %v2096_v3 = vmul.f32 0.01, %v2043_v62 }
 0x397   : > { %v2245_v4 = vpack.c.bf16 %v2239_v16, %v2238_v52 }
 0x398   : > { %v2144_v34 = vmax.f32 %v2043_v62, %v2096_v3 }
 0x399   : > { %3001 = vmatmul.msk.bf16.gmra.mxu0 %vm1850_vm4, %v2245_v4 }
 0x39a   : > { %v2201_v51 = vsel %vm1850_vm4, %v2144_v34, -inf }
 0x39b   : > { %v2044_v60 = vpop.f32.mrf.mxu3  ;;  %v2202_v2 = vmax.f32 %v4465_v48, %v2201_v51 }
 0x39c   : > { %v2045_v49 = vadd.f32 %v4201_v56, %v2044_v60 }
 0x39d   : > { %v2240_v32 = vadd.f32 %v2202_v2, %v3929_v10  ;;  %v2233_v10 = vmax.f32 %v2231_v24, %v2232_v22 }
 0x39e   : > { %v2097_v58 = vmul.f32 0.01, %v2045_v49 }
 0x3a0   : > { %v2145_v11 = vmax.f32 %v2045_v49, %v2097_v58 }
 0x3a2   : > { %v2212_v7 = vsel %vm1850_vm4, %v2145_v11, -inf }
 0x3a3   : > { %v2213_v26 = vmax.f32 %v2211_v12, %v2212_v7  ;;  %v2047_v14 = vpop.f32.mrf.mxu3 }
 0x3a4   : > { %v2048_v18 = vadd.f32 %v4201_v56, %v2047_v14 }
 0x3a5   : > { %v2241_v8 = vadd.f32 %v2213_v26, %v3939_v20 }
 0x3a6   : > { %v2098_v19 = vmul.f32 0.01, %v2048_v18 }
 0x3a7   : > { %v2246_v61 = vpack.c.bf16 %v2241_v8, %v2240_v32 }
 0x3a8   : > { %v2146_v53 = vmax.f32 %v2048_v18, %v2098_v19 }
 0x3a9   : > { %3002 = vmatmul.msk.bf16.gmra.mxu0 %vm1850_vm4, %v2246_v61 }
 0x3aa   : > { %v2223_v21 = vsel %vm1850_vm4, %v2146_v53, -inf }
 0x3ab   : > { %v2049_v13 = vpop.f32.mrf.mxu3  ;;  %v2224_v20 = vmax.f32 %v4469_v44, %v2223_v21 }
 0x3ac   : > { %v2050_v48 = vadd.f32 %v4201_v56, %v2049_v13 }
 0x3ad   : > { %v2242_v31 = vadd.f32 %v2224_v20, %v3955_v43 }
 0x3ae   : > { %v2099_v23 = vmul.f32 0.01, %v2050_v48 }
 0x3b0   : > { %v2147_v27 = vmax.f32 %v2050_v48, %v2099_v23 }
 0x3b2   : > { %v2234_v1 = vsel %vm1850_vm4, %v2147_v27, -inf }
 0x3b3   : > { %v2235_v59 = vmax.f32 %v2233_v10, %v2234_v1 }
 0x3b5   : > { %v2243_v37 = vadd.f32 %v2235_v59, %v3968_v55 }
 0x3b7   : > { %v2247_v56 = vpack.c.bf16 %v2243_v37, %v2242_v31 }
 0x3b9   : > { %3003 = vmatmul.msk.bf16.gmra.mxu0 %vm1850_vm4, %v2247_v56 }
 0x406   : > { %v2305_v39 = vpop.f32.mrf.mxu0 }
 0x407   : > { %v2306_v17 = vadd.f32 %v3263_v33, %v2305_v39 }
 0x409   : > { %v2325_v40 = vmul.f32 0.01, %v2306_v17 }
 0x40b   : > { %v2333_v5 = vmax.f32 %v2306_v17, %v2325_v40 }
 0x40e   : > { %v2307_v29 = vpop.f32.mrf.mxu0 }
 0x40f   : > { %v2308_v24 = vadd.f32 %v3263_v33, %v2307_v29 }
 0x411   : > { %v2326_v44 = vmul.f32 0.01, %v2308_v24 }
 0x413   : > { %v2334_v6 = vmax.f32 %v2308_v24, %v2326_v44 }
 0x415   : > { %v2341_v54 = vpack.c.bf16 %v2334_v6, %v2333_v5 }
 0x416   : > { %v2310_v45 = vpop.f32.mrf.mxu0 }
 0x417   : > { %3020 = vmatmul.msk.bf16.vlgmr.msrb.gmra.mxu1 %vm1850_vm4, %v2341_v54  ;;  %v2311_v43 = vadd.f32 %v3263_v33, %v2310_v45 }
 0x419   : > { %v2327_v9 = vmul.f32 0.01, %v2311_v43 }
 0x41b   : > { %v2335_v28 = vmax.f32 %v2311_v43, %v2327_v9 }
 0x41e   : > { %v2312_v55 = vpop.f32.mrf.mxu0 }
 0x41f   : > { %v2313_v15 = vadd.f32 %v3263_v33, %v2312_v55 }
 0x421   : > { %v2328_v47 = vmul.f32 0.01, %v2313_v15 }
 0x423   : > { %v2336_v35 = vmax.f32 %v2313_v15, %v2328_v47 }
 0x425   : > { %v2342_v0 = vpack.c.bf16 %v2336_v35, %v2335_v28 }
 0x426   : > { %v2315_v57 = vpop.f32.mrf.mxu0 }
 0x427   : > { %3021 = vmatmul.msk.bf16.gmra.mxu1 %vm1850_vm4, %v2342_v0  ;;  %v2316_v30 = vadd.f32 %v3263_v33, %v2315_v57 }
 0x429   : > { %v2329_v62 = vmul.f32 0.01, %v2316_v30 }
 0x42b   : > { %v2337_v41 = vmax.f32 %v2316_v30, %v2329_v62 }
 0x42e   : > { %v2317_v46 = vpop.f32.mrf.mxu0 }
 0x42f   : > { %v2318_v52 = vadd.f32 %v3263_v33, %v2317_v46 }
 0x431   : > { %v2330_v16 = vmul.f32 0.01, %v2318_v52 }
 0x433   : > { %v2338_v3 = vmax.f32 %v2318_v52, %v2330_v16 }
 0x435   : > { %v2343_v4 = vpack.c.bf16 %v2338_v3, %v2337_v41 }
 0x436   : > { %v2320_v50 = vpop.f32.mrf.mxu0 }
 0x437   : > { %3022 = vmatmul.msk.bf16.gmra.mxu1 %vm1850_vm4, %v2343_v4  ;;  %v2321_v38 = vadd.f32 %v3263_v33, %v2320_v50 }
 0x439   : > { %v2331_v60 = vmul.f32 0.01, %v2321_v38 }
 0x43b   : > { %v2339_v51 = vmax.f32 %v2321_v38, %v2331_v60 }
 0x43e   : > { %v2322_v34 = vpop.f32.mrf.mxu0 }
 0x43f   : > { %v2323_v49 = vadd.f32 %v3263_v33, %v2322_v34 }
 0x441   : > { %v2332_v42 = vmul.f32 0.01, %v2323_v49 }
 0x443   : > { %v2340_v58 = vmax.f32 %v2323_v49, %v2332_v42 }
 0x445   : > { %v2344_v11 = vpack.c.bf16 %v2340_v58, %v2339_v51 }
 0x447   : > { %3023 = vmatmul.msk.bf16.gmra.mxu1 %vm1850_vm4, %v2344_v11 }
 0x494   : > { %v2398_v12 = vpop.f32.mrf.mxu1 }
 0x495   : > { %2419 = vst.msk [vmem:[%s4533_s25] sm:$0xff] %vm2418_vm5, %v2398_v12 }
 0x49c   : > { %v2400_v2 = vpop.f32.mrf.mxu1 }
 0x49d   : > { %2420 = vst.msk [vmem:[%s4533_s25 + $0x8] sm:$0xff] %vm2418_vm5, %v2400_v2 }
 0x4a4   : > { %v2403_v63 = vpop.f32.mrf.mxu1 }
 0x4a5   : > { %2421 = vst.msk [vmem:[%s4533_s25 + $0x10] sm:$0xff] %vm2418_vm5, %v2403_v63 }
 0x4ac   : > { %v2405_v7 = vpop.f32.mrf.mxu1 }
 0x4ad   : > { %2422 = vst.msk [vmem:[%s4533_s25 + $0x18] sm:$0xff] %vm2418_vm5, %v2405_v7 }
 0x4b4   : > { %v2408_v26 = vpop.f32.mrf.mxu1 }
 0x4b5   : > { %2423 = vst.msk [vmem:[%s4533_s25 + $0x20] sm:$0xff] %vm2418_vm5, %v2408_v26 }
 0x4bc   : > { %v2410_v14 = vpop.f32.mrf.mxu1 }
 0x4bd   : > { %2424 = vst.msk [vmem:[%s4533_s25 + $0x28] sm:$0xff] %vm2418_vm5, %v2410_v14 }
 0x4c4   : > { %v2413_v18 = vpop.f32.mrf.mxu1 }
 0x4c5   : > { %2425 = vst.msk [vmem:[%s4533_s25 + $0x30] sm:$0xff] %vm2418_vm5, %v2413_v18 }
 0x4c9   : > { %2433 = sbr.rel (!%p3600_p5) target bundleno = 1272 (0x4f8), region = 126 }
 0x4cc   : > { %v2415_v32 = vpop.f32.mrf.mxu1 }
 0x4cd   : > { %2426 = vst.msk [vmem:[%s4533_s25 + $0x38] sm:$0xff] %vm2418_vm5, %v2415_v32 }
 0x4ce   : > { %s4650_s20 = smov (!%p2436_p4, %s2435_s20), 8 }
 0x4cf   : > { %s3026_s0 = sshll.u32 %s4650_s20, 3 }
 0x4d0   : > { %p3029_p6 = scmp.eq.s32.totalorder %s3026_s0, 0 }
 0x4d1   : > { %s4564_s21 = sshrl.u32 (!%p3029_p6), %s4650_s20, 3 }
 0x4d2   : > { %2444 = sbr.rel (%p3029_p6) target bundleno = 1272 (0x4f8), region = 130  ;;  %p3030_p5 = scmp.le.s32.totalorder (!%p3029_p6), %s4564_s21, 0 }
 0x4d7   : > { %2693 = sbr.rel (%p3030_p5) target bundleno = 1255 (0x4e7), region = 247  ;;  %s4635_s16 = smov (!%p3030_p5), %s4558_s12 }
 0x4d8   : > { %s4636_s24 = smov (!%p3030_p5), %s4533_s25  ;;  %s4573_s15 = smov (!%p3030_p5), 0  }
 0x4d9   : > { %s4575_s26 = smov (!%p3030_p5), 0  }
 0x4dc LB: >> { %v2521_v8 = vld [vmem:[%s3487_s24] sm:$0xff]  ;;  %v2523_v36 = vld [vmem:[%s3487_s24 + $0x8] sm:$0xff]  ;;  %v2525_v19 = vld [vmem:[%s3487_s24 + $0x10] sm:$0xff]  ;;  %s2537_s18 = sadd.s32 1, %s3491_s15  ;;  %s2515_s26 = sadd.s32 1, %s3495_s26   ;;  %s3495_s26 = sphi %s4575_s26, %s2515_s26   ;;  %s3491_s15 = sphi %s4573_s15, %s4638_s15   ;;  %s3487_s24 = sphi %s4636_s24, %s2542_s24   ;;  %s3483_s16 = sphi %s4635_s16, %s4637_s16  }
 0x4dd   : >> { %2522 = vst [vmem:[%s3483_s16] sm:$0xff] %v2521_v8  ;;  %v2527_v61 = vld [vmem:[%s3487_s24 + $0x18] sm:$0xff]  ;;  %p2538_p7 = scmp.ge.s32.totalorder %s2537_s18, %s4564_s21  ;;  %v2529_v25 = vld [vmem:[%s3487_s24 + $0x20] sm:$0xff]  ;;  %v2531_v53 = vld [vmem:[%s3487_s24 + $0x28] sm:$0xff]  ;;  %p2514_p8 = scmp.ge.s32.totalorder %s2515_s26, %s4564_s21 }
 0x4de   : >> { %2524 = vst [vmem:[%s3483_s16 + $0x8] sm:$0xff] %v2523_v36  ;;  %v2533_v13 = vld [vmem:[%s3487_s24 + $0x30] sm:$0xff]  ;;  %v2535_v48 = vld [vmem:[%s3487_s24 + $0x38] sm:$0xff] }
 0x4df   : >> { %2526 = vst [vmem:[%s3483_s16 + $0x10] sm:$0xff] %v2525_v19  ;;  %s4652_s18 = smov (%p2538_p7, %s2537_s18), 0 }
 0x4e0   : >> { %2528 = vst [vmem:[%s3483_s16 + $0x18] sm:$0xff] %v2527_v61  ;;  %s3031_s27 = sshll.u32 %s4652_s18, 6  ;;  %s4638_s15 = smov %s4652_s18 }
 0x4e1   : >> { %2530 = vst [vmem:[%s3483_s16 + $0x20] sm:$0xff] %v2529_v25  ;;  %s2542_s24 = scalar_lea.vmem %s4533_s25, %s3031_s27 [#allocation3]   ;;  %s2543_s30 = scalar_lea.vmem %s4558_s12, %s3031_s27  }
 0x4e2   : >> { %2532 = vst [vmem:[%s3483_s16 + $0x28] sm:$0xff] %v2531_v53  ;;  %2517 = sbr.rel (!%p2514_p8) target bundleno = 1244 (0x4dc), region = 253 }
 0x4e3   : >> { %2534 = vst [vmem:[%s3483_s16 + $0x30] sm:$0xff] %v2533_v13 }
 0x4e4   : >> { %2536 = vst [vmem:[%s3483_s16 + $0x38] sm:$0xff] %v2535_v48  ;;  %s4637_s16 = smov %s2543_s30 }
 0x4e7 PF: > { %s4594_s19 = sand.u32 7, %s4650_s20   ;;  %s3091_s22 = sshll.u32 %s4564_s21, 6 }
 0x4e8   : > { %s2548_s23 = scalar_lea.vmem %s4533_s25, %s3091_s22 [#allocation3]   ;;  %s2550_s13 = scalar_lea.vmem %s4558_s12, %s3091_s22  }
 0x4e9   : > { %p3036_p9 = scmp.le.s32.totalorder %s4594_s19, 0 }
 0x4ea   : > { %s3497_s28 = smov (!%p3036_p9), %s2550_s13   ;;  %s3501_s29 = smov (!%p3036_p9), %s2548_s23  }
 0x4eb   : > { %2707 = sbr.rel (%p3036_p9) target bundleno = 1272 (0x4f8), region = 258  ;;  %s3505_s11 = smov (!%p3036_p9), 0  }
 0x4ec   : > { %s3509_s0 = smov (!%p3036_p9), 0  }
 0x4f0 LB: >> { %v2560_v22 = vld [vmem:[%s3503_s29] sm:$0xff]  ;;  %s2562_s20 = sadd.s32 1, %s3507_s11  ;;  %s2554_s0 = sadd.s32 1, %s3511_s0   ;;  %s3511_s0 = sphi %s3509_s0, %s2554_s0   ;;  %s3507_s11 = sphi %s3505_s11, %s3506_s11   ;;  %s3503_s29 = sphi %s3501_s29, %s2567_s29   ;;  %s3499_s28 = sphi %s3497_s28, %s2568_s28  }
 0x4f1   : >> { %2561 = vst [vmem:[%s3499_s28] sm:$0xff] %v2560_v22  ;;  %p2563_p10 = scmp.ge.s32.totalorder %s2562_s20, %s4594_s19  ;;  %p2553_p11 = scmp.ge.s32.totalorder %s2554_s0, %s4594_s19 }
 0x4f3   : >> { %s4654_s20 = smov (%p2563_p10, %s2562_s20), 0  ;;  %2556 = sbr.rel (!%p2553_p11) target bundleno = 1264 (0x4f0), region = 264 }
 0x4f4   : >> { %s3037_s25 = sshll.u32 %s4654_s20, 3  ;;  %s3506_s11 = smov %s4654_s20  }
 0x4f5   : >> { %s2567_s29 = scalar_lea.vmem %s2548_s23, %s3037_s25 [#allocation3]   ;;  %s2568_s28 = scalar_lea.vmem %s2550_s13, %s3037_s25  }
 0x4f8 PF: > { %s4639_s12 = sld [smem:[#allocation4_spill]]  ;;  %p17_p12 = scmp.ge.s32.totalorder %s3588_s17, 6  }
 0x4f9   : > { %s4640_s13 = smov %s3443_s14  ;;  %s4642_s15 = smov %s3588_s17 }
 0x4fa   :  { %19 = sbr.rel (!%p17_p12) target bundleno = 4 (0x4), region = 275 }
 0x4fe   : > { %s4641_s14 = smov %s4639_s12 }

</bundles_post_ra>
